<compile_context>
chip_gen: v7x
topology: tpu7x:2x2x1
jax: 0.10.0
libtpu: 0.0.40
codegen_flags: <defaults>
</compile_context>

<pallas_src>
import jax
import jax.numpy as jnp
from jax.experimental import pallas as pl
from jax.experimental.pallas import tpu as pltpu


def _round_up(x, m):
    return ((x + m - 1) // m) * m


def _vmem_limit_bytes():
    """Generation-dependent scoped-VMEM limit (96 MiB v5e/v6e, 48 MiB v7x)."""
    try:
        cap = pltpu.get_tpu_info().vmem_capacity_bytes
        return min(int(cap * 3 // 4), 100 * 1024 * 1024)
    except Exception:
        return 48 * 1024 * 1024


def _resident_spec(shape, index_map):
    """BlockSpec for per-batch resident operands: single-buffered (their DMA
    only fires once per batch, so double-buffering just wastes VMEM)."""
    try:
        return pl.BlockSpec(shape, index_map, pipeline_mode=pl.Buffered(1))
    except Exception:  # older jax without pipeline_mode / Buffered
        return pl.BlockSpec(shape, index_map)


# ----------------------------- Pallas kernels -----------------------------

def _conv1x1_prelu_kernel(x_ref, w_ref, b_ref, a_ref, o_ref):
    # x: (TP, Cin) bf16, w: (Cin, Coutp) bf16, b/a: (1, Coutp) f32
    y = jnp.dot(x_ref[...], w_ref[...], preferred_element_type=jnp.float32)
    y = y + b_ref[...]
    o_ref[...] = jnp.where(y >= 0.0, y, a_ref[...] * y)


def conv1x1_prelu(x2d, w, b, alpha, *, tile_rows=4096):
    """1x1 conv (matmul) + bias + per-channel PReLU on a (pixels, Cin) slab.

    Pixel axis is tiled ("parallel" grid); weights / bias / alpha are
    replicated per tile.  MXU inputs are bf16 (f32 accumulation); the output
    width is padded to a multiple of 128 so stores are lane-dense.
    """
    n, cin = x2d.shape
    cout = w.shape[1]
    coutp = _round_up(cout, 128)                 # lane-dense output stores
    num_tiles = -(-n // tile_rows)
    tp = _round_up(-(-n // num_tiles), 8)
    n_pad = tp * num_tiles

    x_b = x2d.astype(jnp.bfloat16)               # bf16 MXU feed (HBM-bound op)
    if n_pad != n:
        x_b = jnp.pad(x_b, ((0, n_pad - n), (0, 0)))
    w_b = jnp.pad(w.astype(jnp.bfloat16), ((0, 0), (0, coutp - cout)))
    b_p = jnp.pad(b.reshape(1, cout).astype(jnp.float32),
                  ((0, 0), (0, coutp - cout)))
    a_p = jnp.pad(alpha.reshape(1, cout).astype(jnp.float32),
                  ((0, 0), (0, coutp - cout)))

    out = pl.pallas_call(
        _conv1x1_prelu_kernel,
        out_shape=jax.ShapeDtypeStruct((n_pad, coutp), jnp.float32),
        grid=(num_tiles,),
        in_specs=[
            pl.BlockSpec((tp, cin), lambda i: (i, 0)),
            pl.BlockSpec((cin, coutp), lambda i: (0, 0)),
            pl.BlockSpec((1, coutp), lambda i: (0, 0)),
            pl.BlockSpec((1, coutp), lambda i: (0, 0)),
        ],
        out_specs=pl.BlockSpec((tp, coutp), lambda i: (i, 0)),
        compiler_params=pltpu.CompilerParams(
            dimension_semantics=("parallel",),
            vmem_limit_bytes=_vmem_limit_bytes()),
    )(x_b, w_b, b_p, a_p)
    return out[:n, :cout]


def _make_csa_kernel(L, Lp):
    def kernel(xq_ref, wt_ref, rw_ref, o_ref):
        # xq: (1, TQ, CKp) bf16 (softmax_scale pre-folded)
        # wt: (1, CKp, Lp)  bf16 (normalized ref patches, K-major, resident)
        # rw: (1, Lp, CKKp) bf16 (raw assembly patches, resident)
        s = jnp.dot(xq_ref[0], wt_ref[0], preferred_element_type=jnp.float32)
        if Lp != L:
            # padded reference-patch columns MUST NOT receive softmax mass
            col = jax.lax.broadcasted_iota(jnp.int32, (1, Lp), 1)
            s = jnp.where(col < L, s, -jnp.inf)
        # softmax over the L (ref patch) axis, f32; only one (TQ, Lp) f32
        # temporary stays live (e consumes s, attn is cast to bf16 at once)
        m = jnp.max(s, axis=-1, keepdims=True)
        e = jnp.exp(s - m)
        inv = pl.reciprocal(jnp.sum(e, axis=-1, keepdims=True), approx=True)
        a = (e * inv).astype(jnp.bfloat16)
        # aggregation: bf16 MXU matmul, f32 accumulation, bf16 lane-dense store
        o_ref[0] = jnp.dot(a, rw_ref[0],
                           preferred_element_type=jnp.float32).astype(o_ref.dtype)
    return kernel


def csa_attention(xpat, wpat, rawpat, softmax_scale, *, tile_q=None):
    """Fused patch-norm / score matmul / softmax / aggregation.

    xpat:   (B, HW, CK)  query patches (f32)
    wpat:   (B, L,  CK)  reference patches, un-normalized (f32)
    rawpat: (B, L,  CKK) raw assembly patches (f32)
    returns (B, HW, CKK) bf16
    """
    B, HW, CK = xpat.shape
    _, L, _ = wpat.shape
    _, _, CKK = rawpat.shape
    ckp = _round_up(CK, 128)      # pad contraction dim -> full MXU feed
    ckkp = _round_up(CKK, 128)    # pad output dim -> unmasked lane-dense store
    Lp = _round_up(L, 128)        # pad ref-patch dim -> dense matmul feeds

    vmem_limit = _vmem_limit_bytes()
    if tile_q is None:
        # 512 when the VMEM budget allows (v5e/v6e), 256 on v7x's 64 MiB
        tile_q = 512 if vmem_limit >= 80 * 1024 * 1024 else 256

    # Hoisted out of the query-tile loop: L2 norm (escape_NaN=1e-4) in f32,
    # then K-major transpose so the score matmul is (TQ, CK) @ (CK, L).
    norm = jnp.sqrt(jnp.sum(wpat * wpat, axis=-1, keepdims=True))
    wn_t = jnp.transpose(wpat / jnp.maximum(norm, 1e-4), (0, 2, 1))   # (B,CK,L)
    wn_t = jnp.pad(wn_t, ((0, 0), (0, ckp - CK), (0, Lp - L))).astype(jnp.bfloat16)

    # fold softmax_scale into the query patches (scores are linear in xq)
    xq = jnp.pad(xpat * softmax_scale,
                 ((0, 0), (0, 0), (0, ckp - CK))).astype(jnp.bfloat16)
    rw = jnp.pad(rawpat,
                 ((0, 0), (0, Lp - L), (0, ckkp - CKK))).astype(jnp.bfloat16)

    # query-axis tiling
    num_q = -(-HW // tile_q)
    tq = _round_up(-(-HW // num_q), 8)
    hw_pad = tq * num_q
    if hw_pad != HW:
        xq = jnp.pad(xq, ((0, 0), (0, hw_pad - HW), (0, 0)))

    out = pl.pallas_call(
        _make_csa_kernel(L, Lp),
        out_shape=jax.ShapeDtypeStruct((B, hw_pad, ckkp), jnp.bfloat16),
        grid=(B, num_q),   # batch leading -> megacore shards on b when B > 1
        in_specs=[
            pl.BlockSpec((1, tq, ckp), lambda b, q: (b, q, 0)),
            # constant along q -> DMA'd once per batch, single-buffered
            _resident_spec((1, ckp, Lp), lambda b, q: (b, 0, 0)),
            _resident_spec((1, Lp, ckkp), lambda b, q: (b, 0, 0)),
        ],
        out_specs=pl.BlockSpec((1, tq, ckkp), lambda b, q: (b, q, 0)),
        compiler_params=pltpu.CompilerParams(
            dimension_semantics=("parallel", "parallel"),
            vmem_limit_bytes=vmem_limit),
    )(xq, wn_t, rw)
    return out[:, :HW, :CKK]


# ------------------------------ JAX glue ----------------------------------

def same_pads(H, W, k, stride):
    """Replicates same_padding() from the PyTorch reference."""
    oh = (H + stride - 1) // stride
    ow = (W + stride - 1) // stride
    pr = max(0, (oh - 1) * stride + k - H)
    pc = max(0, (ow - 1) * stride + k - W)
    pt, pb = pr // 2, pr - pr // 2
    plft, prt = pc // 2, pc - pc // 2
    return (pt, pb, plft, prt), oh, ow


def extract_patches_hwc(x, k, stride, pads):
    """x: (H, W, C) -> (oh, ow, C, k, k), patch channel order (c, ki, kj)."""
    pt, pb, plft, prt = pads
    xp = jnp.pad(x, ((pt, pb), (plft, prt), (0, 0)))
    Hp, Wp, C = xp.shape
    oh = (Hp - k) // stride + 1
    ow = (Wp - k) // stride + 1
    slabs = []
    for ki in range(k):
        for kj in range(k):
            slabs.append(xp[ki:ki + stride * oh:stride,
                            kj:kj + stride * ow:stride, :])
    p = jnp.stack(slabs, axis=-1)            # (oh, ow, C, k*k), last axis (ki, kj)
    return p.reshape(oh, ow, C, k, k)


def bilinear_downsample(x, Ho, Wo):
    """F.interpolate(mode='bilinear', align_corners=False) equivalent, NHWC."""
    B, H, W, C = x.shape
    sy, sx = H / Ho, W / Wo
    ys = (jnp.arange(Ho, dtype=jnp.float32) + 0.5) * sy - 0.5
    xs = (jnp.arange(Wo, dtype=jnp.float32) + 0.5) * sx - 0.5
    ys = jnp.maximum(ys, 0.0)
    xs = jnp.maximum(xs, 0.0)
    y0 = jnp.minimum(jnp.floor(ys).astype(jnp.int32), H - 1)
    x0 = jnp.minimum(jnp.floor(xs).astype(jnp.int32), W - 1)
    y1 = jnp.minimum(y0 + 1, H - 1)
    x1 = jnp.minimum(x0 + 1, W - 1)
    wy = (ys - y0.astype(jnp.float32))[None, :, None, None]
    wx = (xs - x0.astype(jnp.float32))[None, None, :, None]
    top = x[:, y0, :, :]
    bot = x[:, y1, :, :]
    row = top * (1.0 - wy) + bot * wy
    left = row[:, :, x0, :]
    right = row[:, :, x1, :]
    return left * (1.0 - wx) + right * wx


def overlap_add(out_patch, B, H, W, C, ksize, scale):
    """conv_transpose2d(stride=scale, padding=scale) as 9 shifted adds.

    out_patch: (B, H*W, C*K*K) with K = scale*ksize, kernel index ki = scale*a + r.
    output pixel row = scale*(i + a - 1) + r   (NHWC result: (B, scale*H, scale*W, C)).
    """
    v = out_patch.reshape(B, H, W, C, ksize, scale, ksize, scale)   # stays bf16
    acc = jnp.zeros((B, H + ksize - 1, scale, W + ksize - 1, scale, C), jnp.float32)
    for a in range(ksize):
        for b in range(ksize):
            slab = v[:, :, :, :, a, :, b, :].astype(jnp.float32)   # (B,H,W,C,s,s)
            slab = jnp.transpose(slab, (0, 1, 4, 2, 5, 3))         # (B,H,s,W,s,C)
            acc = acc.at[:, a:a + H, :, b:b + W, :, :].add(slab)
    # padding=scale crops exactly one coarse block on each side
    return acc[:, 1:H + 1, :, 1:W + 1, :, :].reshape(B, scale * H, scale * W, C)


# --------------------------- full forward pass -----------------------------

def cross_scale_attention(x_nchw, params, *, ksize=3, scale=3, stride=1,
                          softmax_scale=10.0, reduction=2):
    assert stride == 1, "reference module is used with stride=1"
    B, C, H, W = x_nchw.shape
    assert H % scale == 0 and W % scale == 0
    Ck = C // reduction
    K = scale * ksize

    x = jnp.transpose(x_nchw, (0, 2, 3, 1)).astype(jnp.float32)   # NHWC
    xf = x.reshape(B * H * W, C)

    # conv_assembly (C->C) and conv_match_1 (C->Ck) fused into one pixel-tiled
    # matmul kernel: x is read once, output padded to a lane-dense width.
    w_cat = jnp.concatenate([params["w_asm"], params["w_m1"]], axis=1)
    b_cat = jnp.concatenate([params["b_asm"], params["b_m1"]])
    a_cat = jnp.concatenate([jnp.full((C,), params["a_asm"], jnp.float32),
                             jnp.full((Ck,), params["a_m1"], jnp.float32)])
    fused = conv1x1_prelu(xf, w_cat, b_cat, a_cat)
    embed_w = fused[:, :C].reshape(B, H, W, C)
    match1 = fused[:, C:].reshape(B, H, W, Ck)

    Hr, Wr = H // scale, W // scale
    ref_in = bilinear_downsample(x, Hr, Wr)
    match2 = conv1x1_prelu(
        ref_in.reshape(B * Hr * Wr, C), params["w_m2"], params["b_m2"],
        jnp.full((Ck,), params["a_m2"], jnp.float32)).reshape(B, Hr, Wr, Ck)

    # raw assembly patches: K x K, stride = scale, 'same' padding
    pads_raw, orh, orw = same_pads(H, W, K, scale * stride)
    raww = jax.vmap(lambda im: extract_patches_hwc(im, K, scale * stride, pads_raw)
                    .reshape(orh * orw, C * K * K))(embed_w)

    # reference (downscaled) patches: ksize x ksize, stride 1, 'same'
    pads_w, owh, oww = same_pads(Hr, Wr, ksize, stride)
    wpat = jax.vmap(lambda im: extract_patches_hwc(im, ksize, stride, pads_w)
                    .reshape(owh * oww, Ck * ksize * ksize))(match2)
    assert orh * orw == owh * oww, "patch grids must match (H,W divisible by scale)"

    # query patches from match_input: ksize x ksize, stride 1, 'same'
    pads_x, oxh, oxw = same_pads(H, W, ksize, stride)
    xpat = jax.vmap(lambda im: extract_patches_hwc(im, ksize, stride, pads_x)
                    .reshape(oxh * oxw, Ck * ksize * ksize))(match1)

    # fused norm / score matmul / softmax / aggregation matmul (Pallas, bf16 MXU)
    out_patch = csa_attention(xpat, wpat, raww, softmax_scale)     # (B, HW, C*K*K) bf16

    # conv_transpose2d overlap-add (9 shifted adds) kept in plain JAX (see
    # TODO(synk) at top of file for the fusion trade-off analysis).
    y = overlap_add(out_patch, B, H, W, C, ksize, scale) / 6.0     # (B, sH, sW, C)
    return jnp.transpose(y, (0, 3, 1, 2))                          # NCHW


# ----------------------------- parameters ----------------------------------

def init_params(key, C, reduction):
    Ck = C // reduction
    ks = jax.random.split(key, 6)
    return {
        # conv_assembly: C -> C (1x1) + PReLU(0.25)
        "w_asm": 0.1 * jax.random.normal(ks[0], (C, C), jnp.float32),
        "b_asm": 0.01 * jax.random.normal(ks[1], (C,), jnp.float32),
        "a_asm": 0.25,
        # conv_match_1: C -> C//reduction (1x1) + PReLU(0.25)
        "w_m1": 0.1 * jax.random.normal(ks[2], (C, Ck), jnp.float32),
        "b_m1": 0.01 * jax.random.normal(ks[3], (Ck,), jnp.float32),
        "a_m1": 0.25,
        # conv_match_2: C -> C//reduction (1x1) + PReLU(0.25)
        "w_m2": 0.1 * jax.random.normal(ks[4], (C, Ck), jnp.float32),
        "b_m2": 0.01 * jax.random.normal(ks[5], (Ck,), jnp.float32),
        "a_m2": 0.25,
    }


if __name__ == "__main__":
    key = jax.random.PRNGKey(0)
    kx, kp = jax.random.split(key)

    B, C, H, W = 2, 16, 12, 12          # small, H,W divisible by scale=3
    x = jax.random.normal(kx, (B, C, H, W), jnp.float32)
    params = init_params(kp, C, reduction=2)

    fwd = jax.jit(lambda xx, pp: cross_scale_attention(
        xx, pp, ksize=3, scale=3, stride=1, softmax_scale=10.0, reduction=2))
    y = fwd(x, params)
    y = jax.block_until_ready(y)
    assert y.shape == (B, C, 3 * H, 3 * W), y.shape
    assert jnp.all(jnp.isfinite(y))
    print("KERNEL_OK")
</pallas_src>

<mosaic_0001>
module attributes {stable_mosaic.version = 11 : i64} {
  func.func @_conv1x1_prelu_kernel(%arg0: i32, %arg1: memref<32x16xbf16, #tpu.memory_space<vmem>>, %arg2: memref<16x128xbf16, #tpu.memory_space<vmem>>, %arg3: memref<1x128xf32, #tpu.memory_space<vmem>>, %arg4: memref<1x128xf32, #tpu.memory_space<vmem>>, %arg5: memref<32x128xf32, #tpu.memory_space<vmem>>) attributes {dimension_semantics = [#tpu.dimension_semantics<parallel>], iteration_bounds = array<i64: 1>, scalar_prefetch = 0 : i64, scratch_operands = 0 : i64, tpu.core_type = #tpu.core_type<tc>, window_params = [{transform_indices = @transform_0, window_bounds = array<i64: 32, 16>}, {pipeline_mode = #tpu.pipeline_mode<synchronous>, transform_indices = @transform_1, window_bounds = array<i64: 16, 128>}, {pipeline_mode = #tpu.pipeline_mode<synchronous>, transform_indices = @transform_2, window_bounds = array<i64: 1, 128>}, {pipeline_mode = #tpu.pipeline_mode<synchronous>, transform_indices = @transform_3, window_bounds = array<i64: 1, 128>}, {transform_indices = @transform_4, window_bounds = array<i64: 32, 128>}]} {
    %c0 = arith.constant 0 : index
    %c0_0 = arith.constant 0 : index
    %0 = vector.load %arg1[%c0, %c0_0] : memref<32x16xbf16, #tpu.memory_space<vmem>>, vector<32x16xbf16>
    %c0_1 = arith.constant 0 : index
    %c0_2 = arith.constant 0 : index
    %1 = vector.load %arg2[%c0_1, %c0_2] : memref<16x128xbf16, #tpu.memory_space<vmem>>, vector<16x128xbf16>
    %cst = arith.constant dense<0.000000e+00> : vector<32x128xf32>
    %2 = tpu.matmul %0, %1, %cst {dimension_numbers = #tpu.dot_dimension_numbers<[1], [0], [0], [1], [0, 0, 1, 1], [], []>} : vector<32x16xbf16>, vector<16x128xbf16>, vector<32x128xf32> -> vector<32x128xf32>
    %c0_3 = arith.constant 0 : index
    %c0_4 = arith.constant 0 : index
    %3 = vector.load %arg3[%c0_3, %c0_4] : memref<1x128xf32, #tpu.memory_space<vmem>>, vector<1x128xf32>
    %4 = vector.broadcast %3 : vector<1x128xf32> to vector<32x128xf32>
    %5 = arith.addf %2, %4 : vector<32x128xf32>
    %cst_5 = arith.constant 0.000000e+00 : f32
    %6 = vector.broadcast %cst_5 : f32 to vector<32x128xf32>
    %7 = arith.cmpf oge, %5, %6 : vector<32x128xf32>
    %c0_6 = arith.constant 0 : index
    %c0_7 = arith.constant 0 : index
    %8 = vector.load %arg4[%c0_6, %c0_7] : memref<1x128xf32, #tpu.memory_space<vmem>>, vector<1x128xf32>
    %9 = vector.broadcast %8 : vector<1x128xf32> to vector<32x128xf32>
    %10 = arith.mulf %9, %5 : vector<32x128xf32>
    %11 = arith.select %7, %5, %10 : vector<32x128xi1>, vector<32x128xf32>
    %c0_8 = arith.constant 0 : index
    %c0_9 = arith.constant 0 : index
    %12 = vector.load %arg5[%c0_8, %c0_9] : memref<32x128xf32, #tpu.memory_space<vmem>>, vector<32x128xf32>
    tpu.vector_store %arg5[%c0_8, %c0_9], %11 {strides = array<i32>} : memref<32x128xf32, #tpu.memory_space<vmem>>, vector<32x128xf32>,
    return
  }
  func.func @transform_0(%arg0: i32) -> (i32, i32) {
    %c0_i32 = arith.constant 0 : i32
    %c0_i32_0 = arith.constant 0 : i32
    return %arg0, %c0_i32 : i32, i32
  }
  func.func @transform_1(%arg0: i32) -> (i32, i32) {
    %c0_i32 = arith.constant 0 : i32
    %c0_i32_0 = arith.constant 0 : i32
    %c0_i32_1 = arith.constant 0 : i32
    return %c0_i32, %c0_i32_0 : i32, i32
  }
  func.func @transform_2(%arg0: i32) -> (i32, i32) {
    %c0_i32 = arith.constant 0 : i32
    %c0_i32_0 = arith.constant 0 : i32
    %c0_i32_1 = arith.constant 0 : i32
    return %c0_i32, %c0_i32_0 : i32, i32
  }
  func.func @transform_3(%arg0: i32) -> (i32, i32) {
    %c0_i32 = arith.constant 0 : i32
    %c0_i32_0 = arith.constant 0 : i32
    %c0_i32_1 = arith.constant 0 : i32
    return %c0_i32, %c0_i32_0 : i32, i32
  }
  func.func @transform_4(%arg0: i32) -> (i32, i32) {
    %c0_i32 = arith.constant 0 : i32
    %c0_i32_0 = arith.constant 0 : i32
    return %arg0, %c0_i32 : i32, i32
  }
}

module attributes {stable_mosaic.version = 11 : i64} {
  func.func @_conv1x1_prelu_kernel(%arg0: i32, %arg1: memref<288x16xbf16, #tpu.memory_space<vmem>>, %arg2: memref<16x128xbf16, #tpu.memory_space<vmem>>, %arg3: memref<1x128xf32, #tpu.memory_space<vmem>>, %arg4: memref<1x128xf32, #tpu.memory_space<vmem>>, %arg5: memref<288x128xf32, #tpu.memory_space<vmem>>) attributes {dimension_semantics = [#tpu.dimension_semantics<parallel>], iteration_bounds = array<i64: 1>, scalar_prefetch = 0 : i64, scratch_operands = 0 : i64, tpu.core_type = #tpu.core_type<tc>, window_params = [{transform_indices = @transform_0, window_bounds = array<i64: 288, 16>}, {pipeline_mode = #tpu.pipeline_mode<synchronous>, transform_indices = @transform_1, window_bounds = array<i64: 16, 128>}, {pipeline_mode = #tpu.pipeline_mode<synchronous>, transform_indices = @transform_2, window_bounds = array<i64: 1, 128>}, {pipeline_mode = #tpu.pipeline_mode<synchronous>, transform_indices = @transform_3, window_bounds = array<i64: 1, 128>}, {transform_indices = @transform_4, window_bounds = array<i64: 288, 128>}]} {
    %c0 = arith.constant 0 : index
    %c0_0 = arith.constant 0 : index
    %0 = vector.load %arg1[%c0, %c0_0] : memref<288x16xbf16, #tpu.memory_space<vmem>>, vector<288x16xbf16>
    %c0_1 = arith.constant 0 : index
    %c0_2 = arith.constant 0 : index
    %1 = vector.load %arg2[%c0_1, %c0_2] : memref<16x128xbf16, #tpu.memory_space<vmem>>, vector<16x128xbf16>
    %cst = arith.constant dense<0.000000e+00> : vector<288x128xf32>
    %2 = tpu.matmul %0, %1, %cst {dimension_numbers = #tpu.dot_dimension_numbers<[1], [0], [0], [1], [0, 0, 1, 1], [], []>} : vector<288x16xbf16>, vector<16x128xbf16>, vector<288x128xf32> -> vector<288x128xf32>
    %c0_3 = arith.constant 0 : index
    %c0_4 = arith.constant 0 : index
    %3 = vector.load %arg3[%c0_3, %c0_4] : memref<1x128xf32, #tpu.memory_space<vmem>>, vector<1x128xf32>
    %4 = vector.broadcast %3 : vector<1x128xf32> to vector<288x128xf32>
    %5 = arith.addf %2, %4 : vector<288x128xf32>
    %cst_5 = arith.constant 0.000000e+00 : f32
    %6 = vector.broadcast %cst_5 : f32 to vector<288x128xf32>
    %7 = arith.cmpf oge, %5, %6 : vector<288x128xf32>
    %c0_6 = arith.constant 0 : index
    %c0_7 = arith.constant 0 : index
    %8 = vector.load %arg4[%c0_6, %c0_7] : memref<1x128xf32, #tpu.memory_space<vmem>>, vector<1x128xf32>
    %9 = vector.broadcast %8 : vector<1x128xf32> to vector<288x128xf32>
    %10 = arith.mulf %9, %5 : vector<288x128xf32>
    %11 = arith.select %7, %5, %10 : vector<288x128xi1>, vector<288x128xf32>
    %c0_8 = arith.constant 0 : index
    %c0_9 = arith.constant 0 : index
    %12 = vector.load %arg5[%c0_8, %c0_9] : memref<288x128xf32, #tpu.memory_space<vmem>>, vector<288x128xf32>
    tpu.vector_store %arg5[%c0_8, %c0_9], %11 {strides = array<i32>} : memref<288x128xf32, #tpu.memory_space<vmem>>, vector<288x128xf32>,
    return
  }
  func.func @transform_0(%arg0: i32) -> (i32, i32) {
    %c0_i32 = arith.constant 0 : i32
    %c0_i32_0 = arith.constant 0 : i32
    return %arg0, %c0_i32 : i32, i32
  }
  func.func @transform_1(%arg0: i32) -> (i32, i32) {
    %c0_i32 = arith.constant 0 : i32
    %c0_i32_0 = arith.constant 0 : i32
    %c0_i32_1 = arith.constant 0 : i32
    return %c0_i32, %c0_i32_0 : i32, i32
  }
  func.func @transform_2(%arg0: i32) -> (i32, i32) {
    %c0_i32 = arith.constant 0 : i32
    %c0_i32_0 = arith.constant 0 : i32
    %c0_i32_1 = arith.constant 0 : i32
    return %c0_i32, %c0_i32_0 : i32, i32
  }
  func.func @transform_3(%arg0: i32) -> (i32, i32) {
    %c0_i32 = arith.constant 0 : i32
    %c0_i32_0 = arith.constant 0 : i32
    %c0_i32_1 = arith.constant 0 : i32
    return %c0_i32, %c0_i32_0 : i32, i32
  }
  func.func @transform_4(%arg0: i32) -> (i32, i32) {
    %c0_i32 = arith.constant 0 : i32
    %c0_i32_0 = arith.constant 0 : i32
    return %arg0, %c0_i32 : i32, i32
  }
}

module attributes {stable_mosaic.version = 11 : i64} {
  func.func @kernel(%arg0: i32, %arg1: i32, %arg2: memref<1x144x128xbf16, #tpu.memory_space<vmem>>, %arg3: memref<1x128x128xbf16, #tpu.memory_space<vmem>>, %arg4: memref<1x128x1408xbf16, #tpu.memory_space<vmem>>, %arg5: memref<1x144x1408xbf16, #tpu.memory_space<vmem>>) attributes {dimension_semantics = [#tpu.dimension_semantics<parallel>, #tpu.dimension_semantics<parallel>], iteration_bounds = array<i64: 2, 1>, scalar_prefetch = 0 : i64, scratch_operands = 0 : i64, tpu.core_type = #tpu.core_type<tc>, window_params = [{transform_indices = @transform_0, window_bounds = array<i64: 1, 144, 128>}, {pipeline_mode = #tpu.pipeline_mode<synchronous>, transform_indices = @transform_1, window_bounds = array<i64: 1, 128, 128>}, {pipeline_mode = #tpu.pipeline_mode<synchronous>, transform_indices = @transform_2, window_bounds = array<i64: 1, 128, 1408>}, {transform_indices = @transform_3, window_bounds = array<i64: 1, 144, 1408>}]} {
    %c0 = arith.constant 0 : index
    %c0_0 = arith.constant 0 : index
    %c0_1 = arith.constant 0 : index
    %0 = vector.load %arg2[%c0, %c0_0, %c0_1] : memref<1x144x128xbf16, #tpu.memory_space<vmem>>, vector<1x144x128xbf16>
    %1 = vector.shape_cast %0 : vector<1x144x128xbf16> to vector<144x128xbf16>
    %c0_2 = arith.constant 0 : index
    %c0_3 = arith.constant 0 : index
    %c0_4 = arith.constant 0 : index
    %2 = vector.load %arg3[%c0_2, %c0_3, %c0_4] : memref<1x128x128xbf16, #tpu.memory_space<vmem>>, vector<1x128x128xbf16>
    %3 = vector.shape_cast %2 : vector<1x128x128xbf16> to vector<128x128xbf16>
    %cst = arith.constant dense<0.000000e+00> : vector<144x128xf32>
    %4 = tpu.matmul %1, %3, %cst {dimension_numbers = #tpu.dot_dimension_numbers<[1], [0], [0], [1], [0, 0, 1, 1], [], []>} : vector<144x128xbf16>, vector<128x128xbf16>, vector<144x128xf32> -> vector<144x128xf32>
    %5 = tpu.iota {dimensions = array<i32: 1>} : vector<1x128xi32>
    %c16_i32 = arith.constant 16 : i32
    %6 = vector.broadcast %c16_i32 : i32 to vector<1x128xi32>
    %7 = arith.cmpi slt, %5, %6 : vector<1x128xi32>
    %cst_5 = arith.constant 0xFF800000 : f32
    %8 = vector.shape_cast %7 : vector<1x128xi1> to vector<1x128xi1>
    %9 = vector.broadcast %8 : vector<1x128xi1> to vector<144x128xi1>
    %10 = vector.broadcast %cst_5 : f32 to vector<144x128xf32>
    %11 = arith.select %9, %4, %10 : vector<144x128xi1>, vector<144x128xf32>
    %cst_6 = arith.constant dense<0xFF800000> : vector<144xf32>
    %12 = vector.multi_reduction <maximumf>, %11, %cst_6 [1] : vector<144x128xf32> to vector<144xf32>
    %13 = vector.shape_cast %12 : vector<144xf32> to vector<144x1xf32>
    %14 = vector.broadcast %13 : vector<144x1xf32> to vector<144x128xf32>
    %15 = arith.subf %11, %14 : vector<144x128xf32>
    %16 = math.exp %15 : vector<144x128xf32>
    %cst_7 = arith.constant dense<0.000000e+00> : vector<144xf32>
    %17 = vector.multi_reduction <add>, %16, %cst_7 [1] : vector<144x128xf32> to vector<144xf32>
    %18 = vector.shape_cast %17 : vector<144xf32> to vector<144x1xf32>
    %19 = tpu.reciprocal %18 {approx = true} : vector<144x1xf32> -> vector<144x1xf32>
    %20 = vector.broadcast %19 : vector<144x1xf32> to vector<144x128xf32>
    %21 = arith.mulf %16, %20 : vector<144x128xf32>
    %22 = arith.truncf %21 : vector<144x128xf32> to vector<144x128xbf16>
    %c0_8 = arith.constant 0 : index
    %c0_9 = arith.constant 0 : index
    %c0_10 = arith.constant 0 : index
    %23 = vector.load %arg4[%c0_8, %c0_9, %c0_10] : memref<1x128x1408xbf16, #tpu.memory_space<vmem>>, vector<1x128x1408xbf16>
    %24 = vector.shape_cast %23 : vector<1x128x1408xbf16> to vector<128x1408xbf16>
    %cst_11 = arith.constant dense<0.000000e+00> : vector<144x1408xf32>
    %25 = tpu.matmul %22, %24, %cst_11 {dimension_numbers = #tpu.dot_dimension_numbers<[1], [0], [0], [1], [0, 0, 1, 1], [], []>} : vector<144x128xbf16>, vector<128x1408xbf16>, vector<144x1408xf32> -> vector<144x1408xf32>
    %26 = arith.truncf %25 : vector<144x1408xf32> to vector<144x1408xbf16>
    %c0_12 = arith.constant 0 : index
    %c0_13 = arith.constant 0 : index
    %c0_14 = arith.constant 0 : index
    %27 = vector.load %arg5[%c0_12, %c0_13, %c0_14] : memref<1x144x1408xbf16, #tpu.memory_space<vmem>>, vector<1x144x1408xbf16>
    %28 = vector.shape_cast %27 : vector<1x144x1408xbf16> to vector<144x1408xbf16>
    %29 = vector.shape_cast %26 : vector<144x1408xbf16> to vector<1x144x1408xbf16>
    tpu.vector_store %arg5[%c0_12, %c0_13, %c0_14], %29 {strides = array<i32>} : memref<1x144x1408xbf16, #tpu.memory_space<vmem>>, vector<1x144x1408xbf16>,
    return
  }
  func.func @transform_0(%arg0: i32, %arg1: i32) -> (i32, i32, i32) {
    %c0_i32 = arith.constant 0 : i32
    %c0_i32_0 = arith.constant 0 : i32
    return %arg0, %arg1, %c0_i32 : i32, i32, i32
  }
  func.func @transform_1(%arg0: i32, %arg1: i32) -> (i32, i32, i32) {
    %c0_i32 = arith.constant 0 : i32
    %c0_i32_0 = arith.constant 0 : i32
    %c0_i32_1 = arith.constant 0 : i32
    return %arg0, %c0_i32, %c0_i32_0 : i32, i32, i32
  }
  func.func @transform_2(%arg0: i32, %arg1: i32) -> (i32, i32, i32) {
    %c0_i32 = arith.constant 0 : i32
    %c0_i32_0 = arith.constant 0 : i32
    %c0_i32_1 = arith.constant 0 : i32
    return %arg0, %c0_i32, %c0_i32_0 : i32, i32, i32
  }
  func.func @transform_3(%arg0: i32, %arg1: i32) -> (i32, i32, i32) {
    %c0_i32 = arith.constant 0 : i32
    %c0_i32_0 = arith.constant 0 : i32
    return %arg0, %arg1, %c0_i32 : i32, i32, i32
  }
}

</mosaic_0001>

<bundles_post_ra>
// kernel: _lambda_.4
= control target key start
LH: loop header
LB: loop body
LE: loop exit
PB: predicated region body
PF: predicated region fallthrough
CT: control target
= control target key end

     0   :  { %vm47_vm0 = vcmask 130048   ;;  %s201_s1 = inlined_call_operand.vmem [shape: bf16[16,128], index: 1, kind: input, shape index: {}]   ;;  %s202_s0 = inlined_call_operand.vmem [shape: bf16[32,16], index: 0, kind: input, shape index: {}]   ;;  %s203_s2 = inlined_call_operand.vmem [shape: f32[1,128], index: 2, kind: input, shape index: {}]   ;;  %s204_s3 = inlined_call_operand.vmem [shape: f32[1,128], index: 3, kind: input, shape index: {}]   ;;  %s205_s4 = inlined_call_operand.vmem [shape: f32[32,128], index: 4, kind: output, shape index: {}]  }
   0x1   :  { %v146_v0 = vld [vmem:[%s201_s1] sm:$0xff]   ;;  %v148_v2 = vld [vmem:[%s202_s0 + $0x8] sm:$0xff]  }
   0x2   :  { %v147_v1 = vld [vmem:[%s202_s0] sm:$0xff]   ;;  %140 = vmatprep.subr.bf16.mxu0 %v146_v0 }
   0x3   :  { %141 = vmatpush3.bf16.msra.mxu0 %v146_v0  ;;  %142 = vmatprep.mubr.msk.bf16.mxu0 %vm47_vm0, %v147_v1  ;;  %v130_v3 = vld [vmem:[%s203_s2] ss:$0 sm:$0xff] }
   0x4   :  { %v136_v5 = vld [vmem:[%s204_s3] ss:$0 sm:$0xff] }
   0x6   :  { %143 = vmatmul.mubr.msk.bf16.vlgmr.msra.gmra.mrb[0].mxu0 %vm47_vm0, %v148_v2 }
  0xd9   :  { %v144_v4 = vpop.f32.mrb[0].mxu0 }
  0xda   :  { %v97_v6 = vadd.f32 %v144_v4, %v130_v3  ;;  %v88_v7 = vpop.f32.mrb[1].mxu0 }
  0xdb   :  { %v89_v8 = vadd.f32 %v130_v3, %v88_v7  ;;  %v145_v9 = vpop.f32.mrb[2].mxu0 }
  0xdc   :  { %vm105_vm1 = vcmp.ge.f32.partialorder %v97_v6, 0.0  ;;  %v116_v10 = vmul.f32 %v136_v5, %v97_v6  ;;  %v100_v11 = vadd.f32 %v145_v9, %v130_v3  ;;  %v91_v12 = vpop.f32.mrb[3].mxu0 }
  0xdd   :  { %vm103_vm2 = vcmp.ge.f32.partialorder %v89_v8, 0.0  ;;  %v114_v13 = vmul.f32 %v136_v5, %v89_v8  ;;  %v92_v14 = vadd.f32 %v130_v3, %v91_v12 }
  0xde   :  { %v120_v15 = vsel %vm105_vm1, %v97_v6, %v116_v10  ;;  %vm106_vm3 = vcmp.ge.f32.partialorder %v100_v11, 0.0  ;;  %v117_v16 = vmul.f32 %v136_v5, %v100_v11 }
  0xdf   :  { %124 = vst [vmem:[%s205_s4 + $0x10] sm:$0xff] %v120_v15  ;;  %v118_v17 = vsel %vm103_vm2, %v89_v8, %v114_v13  ;;  %vm104_vm4 = vcmp.ge.f32.partialorder %v92_v14, 0.0  ;;  %v115_v18 = vmul.f32 %v136_v5, %v92_v14 }
  0xe0   :  { %122 = vst [vmem:[%s205_s4] sm:$0xff] %v118_v17  ;;  %v121_v19 = vsel %vm106_vm3, %v100_v11, %v117_v16 }
  0xe1   :  { %125 = vst [vmem:[%s205_s4 + $0x18] sm:$0xff] %v121_v19  ;;  %v119_v20 = vsel %vm104_vm4, %v92_v14, %v115_v18 }
  0xe2   :  { %123 = vst [vmem:[%s205_s4 + $0x8] sm:$0xff] %v119_v20 }

// kernel: _lambda_.3
= control target key start
LH: loop header
LB: loop body
LE: loop exit
PB: predicated region body
PF: predicated region fallthrough
CT: control target
= control target key end

     0   :  { %vm159_vm0 = vcmask 130048   ;;  %s953_s1 = inlined_call_operand.vmem [shape: bf16[16,128], index: 1, kind: input, shape index: {}]   ;;  %s954_s0 = inlined_call_operand.vmem [shape: bf16[288,16], index: 0, kind: input, shape index: {}]   ;;  %s955_s2 = inlined_call_operand.vmem [shape: f32[1,128], index: 2, kind: input, shape index: {}]   ;;  %s956_s3 = inlined_call_operand.vmem [shape: f32[1,128], index: 3, kind: input, shape index: {}]   ;;  %s957_s4 = inlined_call_operand.vmem [shape: f32[288,128], index: 4, kind: output, shape index: {}]  }
   0x1   :  { %v644_v0 = vld [vmem:[%s953_s1] sm:$0xff]   ;;  %v646_v2 = vld [vmem:[%s954_s0 + $0x8] sm:$0xff]   ;;  %v647_v3 = vld [vmem:[%s954_s0 + $0x50] sm:$0xff]  }
   0x2   :  { %v645_v1 = vld [vmem:[%s954_s0] sm:$0xff]   ;;  %604 = vmatprep.subr.bf16.mxu0 %v644_v0  ;;  %642 = vmatprep.subr.bf16.mxu1 %v644_v0  ;;  %v648_v4 = vld [vmem:[%s954_s0 + $0x58] sm:$0xff]   ;;  %v649_v5 = vld [vmem:[%s954_s0 + $0x10] sm:$0xff]  }
   0x3   :  { %605 = vmatpush3.bf16.msra.mxu0 %v644_v0  ;;  %606 = vmatprep.mubr.msk.bf16.mxu0 %vm159_vm0, %v645_v1  ;;  %v651_v6 = vld [vmem:[%s954_s0 + $0x60] sm:$0xff]   ;;  %v650_v7 = vld [vmem:[%s954_s0 + $0x18] sm:$0xff]   ;;  %v652_v8 = vld [vmem:[%s954_s0 + $0x68] sm:$0xff]  }
   0x4   :  { %643 = vmatpush3.bf16.msra.mxu1 %v644_v0  ;;  %626 = vmatprep.mubr.msk.bf16.mxu1 %vm159_vm0, %v647_v3  ;;  %v653_v9 = vld [vmem:[%s954_s0 + $0x20] sm:$0xff]   ;;  %v655_v10 = vld [vmem:[%s954_s0 + $0x70] sm:$0xff]   ;;  %v654_v11 = vld [vmem:[%s954_s0 + $0x28] sm:$0xff]  }
   0x5   :  { %v656_v12 = vld [vmem:[%s954_s0 + $0x78] sm:$0xff]   ;;  %v657_v13 = vld [vmem:[%s954_s0 + $0x30] sm:$0xff]   ;;  %v659_v14 = vld [vmem:[%s954_s0 + $0x80] sm:$0xff]  }
   0x6   :  { %607 = vmatmul.mubr.msk.bf16.vlgmr.msra.gmra.mrb[0].mxu0 %vm159_vm0, %v646_v2  ;;  %v658_v15 = vld [vmem:[%s954_s0 + $0x38] sm:$0xff]   ;;  %v660_v16 = vld [vmem:[%s954_s0 + $0x88] sm:$0xff]   ;;  %v661_v17 = vld [vmem:[%s954_s0 + $0x40] sm:$0xff]  }
   0x7   :  { %627 = vmatmul.mubr.msk.bf16.vlgmr.msra.gmra.mrb[0].mxu1 %vm159_vm0, %v648_v4  ;;  %610 = vmatprep.mubr.msk.bf16.mxu0 %vm159_vm0, %v649_v5  ;;  %v662_v18 = vld [vmem:[%s954_s0 + $0x48] sm:$0xff]   ;;  %v766_v19 = vld [vmem:[%s955_s2] ss:$0 sm:$0xff] }
   0x8   :  { %630 = vmatprep.mubr.msk.bf16.mxu1 %vm159_vm0, %v651_v6  ;;  %v771_v21 = vld [vmem:[%s956_s3] ss:$0 sm:$0xff] }
   0xe   :  { %611 = vmatmul.mubr.msk.bf16.gmra.mrb[4].mxu0 %vm159_vm0, %v650_v7 }
   0xf   :  { %631 = vmatmul.mubr.msk.bf16.gmra.mrb[4].mxu1 %vm159_vm0, %v652_v8  ;;  %614 = vmatprep.mubr.msk.bf16.mxu0 %vm159_vm0, %v653_v9 }
  0x10   :  { %634 = vmatprep.mubr.msk.bf16.mxu1 %vm159_vm0, %v655_v10 }
  0x16   :  { %615 = vmatmul.mubr.msk.bf16.gmra.mrb[8].mxu0 %vm159_vm0, %v654_v11 }
  0x17   :  { %635 = vmatmul.mubr.msk.bf16.gmra.mrb[8].mxu1 %vm159_vm0, %v656_v12  ;;  %618 = vmatprep.mubr.msk.bf16.mxu0 %vm159_vm0, %v657_v13 }
  0x18   :  { %638 = vmatprep.mubr.msk.bf16.mxu1 %vm159_vm0, %v659_v14 }
  0x1e   :  { %619 = vmatmul.mubr.msk.bf16.gmra.mrb[12].mxu0 %vm159_vm0, %v658_v15 }
  0x1f   :  { %639 = vmatmul.mubr.msk.bf16.gmra.mrb[12].mxu1 %vm159_vm0, %v660_v16  ;;  %622 = vmatprep.mubr.msk.bf16.mxu0 %vm159_vm0, %v661_v17 }
  0x26   :  { %623 = vmatmul.mubr.msk.bf16.gmra.mrb[16].mxu0 %vm159_vm0, %v662_v18 }
  0xd9   :  { %v608_v20 = vpop.f32.mrb[0].mxu0 }
  0xda   :  { %v257_v22 = vadd.f32 %v608_v20, %v766_v19  ;;  %v248_v23 = vpop.f32.mrb[1].mxu0  ;;  %v628_v24 = vpop.f32.mrb[0].mxu1 }
  0xdb   :  { %v249_v25 = vadd.f32 %v766_v19, %v248_v23  ;;  %v609_v26 = vpop.f32.mrb[2].mxu0  ;;  %v337_v27 = vadd.f32 %v628_v24, %v766_v19  ;;  %v328_v28 = vpop.f32.mrb[1].mxu1 }
  0xdc   :  { %vm393_vm1 = vcmp.ge.f32.partialorder %v257_v22, 0.0  ;;  %v436_v29 = vmul.f32 %v771_v21, %v257_v22  ;;  %v260_v30 = vadd.f32 %v609_v26, %v766_v19  ;;  %v251_v31 = vpop.f32.mrb[3].mxu0  ;;  %v329_v32 = vadd.f32 %v766_v19, %v328_v28  ;;  %v629_v33 = vpop.f32.mrb[2].mxu1 }
  0xdd   :  { %vm391_vm2 = vcmp.ge.f32.partialorder %v249_v25, 0.0  ;;  %v434_v34 = vmul.f32 %v771_v21, %v249_v25  ;;  %v252_v35 = vadd.f32 %v766_v19, %v251_v31  ;;  %vm413_vm3 = vcmp.ge.f32.partialorder %v337_v27, 0.0  ;;  %v331_v36 = vpop.f32.mrb[3].mxu1 }
  0xde   :  { %v472_v37 = vsel %vm393_vm1, %v257_v22, %v436_v29  ;;  %vm394_vm4 = vcmp.ge.f32.partialorder %v260_v30, 0.0  ;;  %v437_v38 = vmul.f32 %v771_v21, %v260_v30  ;;  %v456_v39 = vmul.f32 %v771_v21, %v337_v27 }
  0xdf   :  { %508 = vst [vmem:[%s957_s4 + $0x10] sm:$0xff] %v472_v37  ;;  %v470_v40 = vsel %vm391_vm2, %v249_v25, %v434_v34  ;;  %vm392_vm5 = vcmp.ge.f32.partialorder %v252_v35, 0.0  ;;  %v435_v41 = vmul.f32 %v771_v21, %v252_v35  ;;  %vm411_vm6 = vcmp.ge.f32.partialorder %v329_v32, 0.0 }
  0xe0   :  { %506 = vst [vmem:[%s957_s4] sm:$0xff] %v470_v40  ;;  %v473_v42 = vsel %vm394_vm4, %v260_v30, %v437_v38  ;;  %v492_v43 = vsel %vm413_vm3, %v337_v27, %v456_v39  ;;  %v454_v44 = vmul.f32 %v771_v21, %v329_v32  ;;  %v340_v45 = vadd.f32 %v629_v33, %v766_v19 }
  0xe1   :  { %509 = vst [vmem:[%s957_s4 + $0x18] sm:$0xff] %v473_v42  ;;  %v471_v46 = vsel %vm392_vm5, %v252_v35, %v435_v41  ;;  %528 = vst [vmem:[%s957_s4 + $0xb0] sm:$0xff] %v492_v43  ;;  %v332_v47 = vadd.f32 %v766_v19, %v331_v36  ;;  %v612_v48 = vpop.f32.mrb[4].mxu0 }
  0xe2   :  { %507 = vst [vmem:[%s957_s4 + $0x8] sm:$0xff] %v471_v46  ;;  %v490_v49 = vsel %vm411_vm6, %v329_v32, %v454_v44  ;;  %vm414_vm7 = vcmp.ge.f32.partialorder %v340_v45, 0.0  ;;  %v457_v50 = vmul.f32 %v771_v21, %v340_v45  ;;  %v273_v51 = vadd.f32 %v612_v48, %v766_v19  ;;  %v264_v52 = vpop.f32.mrb[5].mxu0  ;;  %v632_v53 = vpop.f32.mrb[4].mxu1 }
  0xe3   :  { %526 = vst [vmem:[%s957_s4 + $0xa0] sm:$0xff] %v490_v49  ;;  %vm412_vm8 = vcmp.ge.f32.partialorder %v332_v47, 0.0  ;;  %v455_v54 = vmul.f32 %v771_v21, %v332_v47  ;;  %v265_v55 = vadd.f32 %v766_v19, %v264_v52  ;;  %v613_v56 = vpop.f32.mrb[6].mxu0  ;;  %v353_v57 = vadd.f32 %v632_v53, %v766_v19  ;;  %v344_v58 = vpop.f32.mrb[5].mxu1 }
  0xe4   :  { %v493_v59 = vsel %vm414_vm7, %v340_v45, %v457_v50  ;;  %vm397_vm9 = vcmp.ge.f32.partialorder %v273_v51, 0.0  ;;  %v440_v60 = vmul.f32 %v771_v21, %v273_v51  ;;  %v276_v61 = vadd.f32 %v613_v56, %v766_v19  ;;  %v267_v62 = vpop.f32.mrb[7].mxu0  ;;  %v633_v63 = vpop.f32.mrb[6].mxu1 }
  0xe5   :  { %529 = vst [vmem:[%s957_s4 + $0xb8] sm:$0xff] %v493_v59  ;;  %v491_v0 = vsel %vm412_vm8, %v332_v47, %v455_v54  ;;  %vm395_vm10 = vcmp.ge.f32.partialorder %v265_v55, 0.0  ;;  %v438_v1 = vmul.f32 %v771_v21, %v265_v55  ;;  %v268_v2 = vadd.f32 %v766_v19, %v267_v62  ;;  %v347_v3 = vpop.f32.mrb[7].mxu1 }
  0xe6   :  { %527 = vst [vmem:[%s957_s4 + $0xa8] sm:$0xff] %v491_v0  ;;  %v476_v4 = vsel %vm397_vm9, %v273_v51, %v440_v60  ;;  %vm398_vm11 = vcmp.ge.f32.partialorder %v276_v61, 0.0  ;;  %v441_v5 = vmul.f32 %v771_v21, %v276_v61  ;;  %vm417_vm12 = vcmp.ge.f32.partialorder %v353_v57, 0.0 }
  0xe7   :  { %512 = vst [vmem:[%s957_s4 + $0x30] sm:$0xff] %v476_v4  ;;  %v474_v6 = vsel %vm395_vm10, %v265_v55, %v438_v1  ;;  %vm396_vm13 = vcmp.ge.f32.partialorder %v268_v2, 0.0  ;;  %v439_v7 = vmul.f32 %v771_v21, %v268_v2  ;;  %v460_v8 = vmul.f32 %v771_v21, %v353_v57 }
  0xe8   :  { %510 = vst [vmem:[%s957_s4 + $0x20] sm:$0xff] %v474_v6  ;;  %v477_v9 = vsel %vm398_vm11, %v276_v61, %v441_v5  ;;  %v345_v10 = vadd.f32 %v766_v19, %v344_v58  ;;  %v356_v11 = vadd.f32 %v633_v63, %v766_v19  ;;  %v348_v12 = vadd.f32 %v766_v19, %v347_v3 }
  0xe9   :  { %513 = vst [vmem:[%s957_s4 + $0x38] sm:$0xff] %v477_v9  ;;  %v475_v13 = vsel %vm396_vm13, %v268_v2, %v439_v7  ;;  %v496_v14 = vsel %vm417_vm12, %v353_v57, %v460_v8  ;;  %v616_v15 = vpop.f32.mrb[8].mxu0 }
  0xea   :  { %511 = vst [vmem:[%s957_s4 + $0x28] sm:$0xff] %v475_v13  ;;  %532 = vst [vmem:[%s957_s4 + $0xd0] sm:$0xff] %v496_v14  ;;  %vm415_vm14 = vcmp.ge.f32.partialorder %v345_v10, 0.0  ;;  %v458_v16 = vmul.f32 %v771_v21, %v345_v10  ;;  %vm418_vm15 = vcmp.ge.f32.partialorder %v356_v11, 0.0  ;;  %v461_v17 = vmul.f32 %v771_v21, %v356_v11  ;;  %v280_v18 = vpop.f32.mrb[9].mxu0  ;;  %v636_v20 = vpop.f32.mrb[8].mxu1 }
  0xeb   :  { %vm416_vm0 = vcmp.ge.f32.partialorder %v348_v12, 0.0  ;;  %v459_v22 = vmul.f32 %v771_v21, %v348_v12  ;;  %v289_v23 = vadd.f32 %v616_v15, %v766_v19  ;;  %v281_v24 = vadd.f32 %v766_v19, %v280_v18  ;;  %v617_v25 = vpop.f32.mrb[10].mxu0  ;;  %v360_v26 = vpop.f32.mrb[9].mxu1 }
  0xec   :  { %v494_v27 = vsel %vm415_vm14, %v345_v10, %v458_v16  ;;  %v497_v28 = vsel %vm418_vm15, %v356_v11, %v461_v17  ;;  %v292_v29 = vadd.f32 %v617_v25, %v766_v19  ;;  %v283_v30 = vpop.f32.mrb[11].mxu0  ;;  %v369_v31 = vadd.f32 %v636_v20, %v766_v19  ;;  %v637_v32 = vpop.f32.mrb[10].mxu1 }
  0xed   :  { %530 = vst [vmem:[%s957_s4 + $0xc0] sm:$0xff] %v494_v27  ;;  %533 = vst [vmem:[%s957_s4 + $0xd8] sm:$0xff] %v497_v28  ;;  %v495_v33 = vsel %vm416_vm0, %v348_v12, %v459_v22  ;;  %vm401_vm1 = vcmp.ge.f32.partialorder %v289_v23, 0.0  ;;  %v444_v34 = vmul.f32 %v771_v21, %v289_v23  ;;  %vm399_vm2 = vcmp.ge.f32.partialorder %v281_v24, 0.0  ;;  %v363_v35 = vpop.f32.mrb[11].mxu1 }
  0xee   :  { %531 = vst [vmem:[%s957_s4 + $0xc8] sm:$0xff] %v495_v33  ;;  %v442_v36 = vmul.f32 %v771_v21, %v281_v24  ;;  %vm402_vm3 = vcmp.ge.f32.partialorder %v292_v29, 0.0  ;;  %v445_v37 = vmul.f32 %v771_v21, %v292_v29  ;;  %v284_v38 = vadd.f32 %v766_v19, %v283_v30 }
  0xef   :  { %v480_v39 = vsel %vm401_vm1, %v289_v23, %v444_v34  ;;  %vm421_vm4 = vcmp.ge.f32.partialorder %v369_v31, 0.0  ;;  %v464_v40 = vmul.f32 %v771_v21, %v369_v31  ;;  %v361_v41 = vadd.f32 %v766_v19, %v360_v26 }
  0xf0   :  { %516 = vst [vmem:[%s957_s4 + $0x50] sm:$0xff] %v480_v39  ;;  %v478_v42 = vsel %vm399_vm2, %v281_v24, %v442_v36  ;;  %v481_v43 = vsel %vm402_vm3, %v292_v29, %v445_v37  ;;  %vm400_vm5 = vcmp.ge.f32.partialorder %v284_v38, 0.0  ;;  %v443_v44 = vmul.f32 %v771_v21, %v284_v38 }
  0xf1   :  { %514 = vst [vmem:[%s957_s4 + $0x40] sm:$0xff] %v478_v42  ;;  %517 = vst [vmem:[%s957_s4 + $0x58] sm:$0xff] %v481_v43  ;;  %v500_v45 = vsel %vm421_vm4, %v369_v31, %v464_v40  ;;  %vm419_vm6 = vcmp.ge.f32.partialorder %v361_v41, 0.0  ;;  %v462_v46 = vmul.f32 %v771_v21, %v361_v41  ;;  %v372_v47 = vadd.f32 %v637_v32, %v766_v19  ;;  %v620_v48 = vpop.f32.mrb[12].mxu0 }
  0xf2   :  { %v479_v49 = vsel %vm400_vm5, %v284_v38, %v443_v44  ;;  %536 = vst [vmem:[%s957_s4 + $0xf0] sm:$0xff] %v500_v45  ;;  %v364_v50 = vadd.f32 %v766_v19, %v363_v35  ;;  %v305_v51 = vadd.f32 %v620_v48, %v766_v19  ;;  %v296_v52 = vpop.f32.mrb[13].mxu0  ;;  %v640_v53 = vpop.f32.mrb[12].mxu1 }
  0xf3   :  { %515 = vst [vmem:[%s957_s4 + $0x48] sm:$0xff] %v479_v49  ;;  %v498_v54 = vsel %vm419_vm6, %v361_v41, %v462_v46  ;;  %vm422_vm7 = vcmp.ge.f32.partialorder %v372_v47, 0.0  ;;  %v465_v55 = vmul.f32 %v771_v21, %v372_v47  ;;  %v297_v56 = vadd.f32 %v766_v19, %v296_v52  ;;  %v621_v57 = vpop.f32.mrb[14].mxu0  ;;  %v376_v58 = vpop.f32.mrb[13].mxu1 }
  0xf4   :  { %534 = vst [vmem:[%s957_s4 + $0xe0] sm:$0xff] %v498_v54  ;;  %vm420_vm8 = vcmp.ge.f32.partialorder %v364_v50, 0.0  ;;  %v463_v59 = vmul.f32 %v771_v21, %v364_v50  ;;  %vm405_vm9 = vcmp.ge.f32.partialorder %v305_v51, 0.0  ;;  %v448_v60 = vmul.f32 %v771_v21, %v305_v51  ;;  %v299_v61 = vpop.f32.mrb[15].mxu0  ;;  %v641_v62 = vpop.f32.mrb[14].mxu1 }
  0xf5   :  { %v501_v63 = vsel %vm422_vm7, %v372_v47, %v465_v55  ;;  %vm403_vm10 = vcmp.ge.f32.partialorder %v297_v56, 0.0  ;;  %v446_v0 = vmul.f32 %v771_v21, %v297_v56  ;;  %v308_v1 = vadd.f32 %v621_v57, %v766_v19  ;;  %v379_v2 = vpop.f32.mrb[15].mxu1 }
  0xf6   :  { %537 = vst [vmem:[%s957_s4 + $0xf8] sm:$0xff] %v501_v63  ;;  %v499_v3 = vsel %vm420_vm8, %v364_v50, %v463_v59  ;;  %v484_v4 = vsel %vm405_vm9, %v305_v51, %v448_v60  ;;  %v300_v5 = vadd.f32 %v766_v19, %v299_v61  ;;  %v385_v6 = vadd.f32 %v640_v53, %v766_v19 }
  0xf7   :  { %535 = vst [vmem:[%s957_s4 + $0xe8] sm:$0xff] %v499_v3  ;;  %520 = vst [vmem:[%s957_s4 + $0x70] sm:$0xff] %v484_v4  ;;  %v482_v7 = vsel %vm403_vm10, %v297_v56, %v446_v0  ;;  %vm406_vm11 = vcmp.ge.f32.partialorder %v308_v1, 0.0  ;;  %v449_v8 = vmul.f32 %v771_v21, %v308_v1  ;;  %v377_v9 = vadd.f32 %v766_v19, %v376_v58 }
  0xf8   :  { %518 = vst [vmem:[%s957_s4 + $0x60] sm:$0xff] %v482_v7  ;;  %vm404_vm12 = vcmp.ge.f32.partialorder %v300_v5, 0.0  ;;  %v447_v10 = vmul.f32 %v771_v21, %v300_v5  ;;  %vm425_vm13 = vcmp.ge.f32.partialorder %v385_v6, 0.0  ;;  %v468_v11 = vmul.f32 %v771_v21, %v385_v6 }
  0xf9   :  { %v485_v12 = vsel %vm406_vm11, %v308_v1, %v449_v8  ;;  %vm423_vm14 = vcmp.ge.f32.partialorder %v377_v9, 0.0  ;;  %v466_v13 = vmul.f32 %v771_v21, %v377_v9  ;;  %v388_v14 = vadd.f32 %v641_v62, %v766_v19  ;;  %v624_v15 = vpop.f32.mrb[16].mxu0 }
  0xfa   :  { %521 = vst [vmem:[%s957_s4 + $0x78] sm:$0xff] %v485_v12  ;;  %v483_v16 = vsel %vm404_vm12, %v300_v5, %v447_v10  ;;  %v504_v17 = vsel %vm425_vm13, %v385_v6, %v468_v11  ;;  %v380_v18 = vadd.f32 %v766_v19, %v379_v2  ;;  %v321_v20 = vadd.f32 %v624_v15, %v766_v19  ;;  %v312_v22 = vpop.f32.mrb[17].mxu0 }
  0xfb   :  { %519 = vst [vmem:[%s957_s4 + $0x68] sm:$0xff] %v483_v16  ;;  %540 = vst [vmem:[%s957_s4 + $0x110] sm:$0xff] %v504_v17  ;;  %v502_v23 = vsel %vm423_vm14, %v377_v9, %v466_v13  ;;  %vm426_vm15 = vcmp.ge.f32.partialorder %v388_v14, 0.0  ;;  %v469_v24 = vmul.f32 %v771_v21, %v388_v14  ;;  %v313_v25 = vadd.f32 %v766_v19, %v312_v22  ;;  %v625_v26 = vpop.f32.mrb[18].mxu0 }
  0xfc   :  { %538 = vst [vmem:[%s957_s4 + $0x100] sm:$0xff] %v502_v23  ;;  %vm424_vm0 = vcmp.ge.f32.partialorder %v380_v18, 0.0  ;;  %v467_v27 = vmul.f32 %v771_v21, %v380_v18  ;;  %vm409_vm1 = vcmp.ge.f32.partialorder %v321_v20, 0.0  ;;  %v452_v28 = vmul.f32 %v771_v21, %v321_v20  ;;  %v315_v29 = vpop.f32.mrb[19].mxu0 }
  0xfd   :  { %v505_v30 = vsel %vm426_vm15, %v388_v14, %v469_v24  ;;  %vm407_vm2 = vcmp.ge.f32.partialorder %v313_v25, 0.0  ;;  %v450_v31 = vmul.f32 %v771_v21, %v313_v25  ;;  %v324_v32 = vadd.f32 %v625_v26, %v766_v19 }
  0xfe   :  { %541 = vst [vmem:[%s957_s4 + $0x118] sm:$0xff] %v505_v30  ;;  %v503_v33 = vsel %vm424_vm0, %v380_v18, %v467_v27  ;;  %v488_v34 = vsel %vm409_vm1, %v321_v20, %v452_v28  ;;  %v316_v35 = vadd.f32 %v766_v19, %v315_v29 }
  0xff   :  { %539 = vst [vmem:[%s957_s4 + $0x108] sm:$0xff] %v503_v33  ;;  %524 = vst [vmem:[%s957_s4 + $0x90] sm:$0xff] %v488_v34  ;;  %v486_v36 = vsel %vm407_vm2, %v313_v25, %v450_v31  ;;  %vm410_vm3 = vcmp.ge.f32.partialorder %v324_v32, 0.0  ;;  %v453_v37 = vmul.f32 %v771_v21, %v324_v32 }
 0x100   :  { %522 = vst [vmem:[%s957_s4 + $0x80] sm:$0xff] %v486_v36  ;;  %vm408_vm4 = vcmp.ge.f32.partialorder %v316_v35, 0.0  ;;  %v451_v38 = vmul.f32 %v771_v21, %v316_v35 }
 0x101   :  { %v489_v19 = vsel %vm410_vm3, %v324_v32, %v453_v37 }
 0x102   :  { %525 = vst [vmem:[%s957_s4 + $0x98] sm:$0xff] %v489_v19  ;;  %v487_v39 = vsel %vm408_vm4, %v316_v35, %v451_v38 }
 0x103   :  { %523 = vst [vmem:[%s957_s4 + $0x88] sm:$0xff] %v487_v39 }

// kernel: _lambda_.5
= control target key start
LH: loop header
LB: loop body
LE: loop exit
PB: predicated region body
PF: predicated region fallthrough
CT: control target
= control target key end

     0   :  { %s3577_s12 = smov 0   ;;  %s3579_s13 = smov 0   ;;  %s4203_s0 = inlined_call_operand.vmem [shape: bf16[2,144,128], index: 0, kind: input, shape index: {}]   ;;  %s4204_s1 = inlined_call_operand.vmem [shape: bf16[2,128,128], index: 1, kind: input, shape index: {}]   ;;  %s4205_s2 = inlined_call_operand.vmem [shape: bf16[2,128,1408], index: 2, kind: input, shape index: {}]   ;;  %s4206_s3 = inlined_call_operand.vmem [shape: bf16[2,144,1408], index: 3, kind: output, shape index: {}]  }
   0x1   :  { %s3581_s14 = smov 0  }
   0x2 LB: > { %s25_s15 = sadd.s32 1, %s3548_s13  ;;  %p2799_p0 = scmp.ge.s32.totalorder %s3552_s14, 1  ;;  %s3552_s14 = sphi %s3581_s14, %s13_s14   ;;  %s3548_s13 = sphi %s3579_s13, %s4208_s13   ;;  %s3544_s12 = sphi %s3577_s12, %s4207_s12  }
   0x3   : > { %p27_p1 = scmp.ge.s32.totalorder %s25_s15, 2  ;;  %p178_p2 = scmp.lt.s32.totalorder %s3552_s14, 3 }
   0x5   : > { %s4210_s15 = smov (%p27_p1, %s25_s15), 0  ;;  %p179_p3 = pnand %p2799_p0, %p178_p2 }
   0x6   : > { %p222_p4 = scmp.lt.s32.totalorder (!%p179_p3), %s3544_s12, 1  ;;  %v3554_v0 = vmov (!%p179_p3), 0.0   ;;  %vm3555_vm0 = vmmov (!%p179_p3), 0   ;;  %v494_v18 = vlaneseq (!%p179_p3) }
   0x7   : > { %182 = sbr.rel (%p179_p3) target bundleno = 1006 (0x3ee), region = 32  ;;  %3163 = vmatprep.subr.bf16.mxu0 (!%p179_p3), %v3554_v0  ;;  %3267 = vmatprep.subr.bf16.mxu1 (!%p179_p3), %v3554_v0 }
   0x8   : > { %3179 = vmatprep.mubr.msk.bf16.mxu0 (!%p179_p3), %vm3555_vm0, %v3554_v0  ;;  %3195 = vmatprep.mubr.msk.bf16.mxu1 (!%p179_p3), %vm3555_vm0, %v3554_v0  ;;  %v3666_v19 = vand.u32 (!%p179_p3), 127, %v494_v18 }
   0xa   : > { %vm496_vm1 = vcmp.lt.s32.totalorder (!%p179_p3), %v3666_v19, 16 }
   0xe   : > { %s4212_s12 = smov (!%p222_p4, %s3544_s12), 1 }
   0xf   : > { %s3020_s16 = sshll.u32 %s4212_s12, 6  ;;  %s3283_s20 = smul.u32 72, %s4212_s12 }
  0x10   : > { %s3607_s19 = scalar_lea.vmem %s4204_s1, %s3020_s16  ;;  %s3284_s24 = smul.u32 704, %s4212_s12 }
  0x11   : > { %v3313_v1 = vld [vmem:[%s3607_s19] sm:$0xff]   ;;  %v3314_v2 = vld [vmem:[%s3607_s19 + $0x8] sm:$0xff]   ;;  %v3315_v3 = vld [vmem:[%s3607_s19 + $0x10] sm:$0xff]   ;;  %s3618_s23 = scalar_lea.vmem %s4203_s0, %s3283_s20  ;;  %s3285_s28 = smul.u32 792, %s4212_s12 }
  0x12   : > { %3164 = vmatpush3.bf16.msra.mxu0 %v3313_v1  ;;  %3275 = vmatpush3.bf16.msra.mxu1 %v3313_v1  ;;  %v3316_v4 = vld [vmem:[%s3607_s19 + $0x18] sm:$0xff]   ;;  %v3317_v5 = vld [vmem:[%s3607_s19 + $0x20] sm:$0xff]   ;;  %s3632_s27 = scalar_lea.vmem %s4205_s2, %s3284_s24  ;;  %v3318_v6 = vld [vmem:[%s3607_s19 + $0x28] sm:$0xff]  }
  0x13   : > { %3165 = vmatprep.subr.bf16.mxu0 %v3554_v0  ;;  %3268 = vmatprep.subr.bf16.mxu1 %v3554_v0  ;;  %v3319_v7 = vld [vmem:[%s3607_s19 + $0x30] sm:$0xff]   ;;  %v3320_v8 = vld [vmem:[%s3607_s19 + $0x38] sm:$0xff]   ;;  %v3321_v9 = vld [vmem:[%s3618_s23] sm:$0xff]   ;;  %s4084_s4 = scalar_lea.vmem %s4206_s3, %s3285_s28 }
  0x14   : > { %v3323_v10 = vld [vmem:[%s3618_s23 + $0x20] sm:$0xff]   ;;  %v3322_v11 = vld [vmem:[%s3618_s23 + $0x8] sm:$0xff]   ;;  %v3324_v13 = vld [vmem:[%s3618_s23 + $0x10] sm:$0xff]  }
  0x15   : > { %v3325_v12 = vld [vmem:[%s3618_s23 + $0x28] sm:$0xff]   ;;  %v3327_v14 = vld [vmem:[%s3618_s23 + $0x30] sm:$0xff]   ;;  %v3326_v15 = vld [vmem:[%s3618_s23 + $0x18] sm:$0xff]  }
  0x16   : > { %3166 = vmatpush3.bf16.msra.mxu0 %v3314_v2  ;;  %3276 = vmatpush3.bf16.msra.mxu1 %v3314_v2  ;;  %v3328_v16 = vld [vmem:[%s3618_s23 + $0x38] sm:$0xff]   ;;  %v3329_v17 = vld [vmem:[%s3618_s23 + $0x40] sm:$0xff]  }
  0x17   : > { %3167 = vmatprep.subr.bf16.mxu0 %v3554_v0  ;;  %3269 = vmatprep.subr.bf16.mxu1 %v3554_v0  ;;  %v3341_v18 = vld [vmem:[%s3632_s27 + $0xb4] ss:$44 sps:$4 sm:$0xff]  }
  0x18   : > { %v3342_v19 = vld [vmem:[%s3632_s27 + $0x60] ss:$44 sps:$4 sm:$0xff]  }
  0x1a   : > { %3168 = vmatpush3.bf16.msra.mxu0 %v3315_v3  ;;  %3277 = vmatpush3.bf16.msra.mxu1 %v3315_v3 }
  0x1b   : > { %3169 = vmatprep.subr.bf16.mxu0 %v3554_v0  ;;  %3270 = vmatprep.subr.bf16.mxu1 %v3554_v0 }
  0x1e   : > { %3170 = vmatpush3.bf16.msra.mxu0 %v3316_v4  ;;  %3278 = vmatpush3.bf16.msra.mxu1 %v3316_v4 }
  0x1f   : > { %3171 = vmatprep.subr.bf16.mxu0 %v3554_v0  ;;  %3271 = vmatprep.subr.bf16.mxu1 %v3554_v0 }
  0x22   : > { %3172 = vmatpush3.bf16.msra.mxu0 %v3317_v5  ;;  %3279 = vmatpush3.bf16.msra.mxu1 %v3317_v5 }
  0x23   : > { %3173 = vmatprep.subr.bf16.mxu0 %v3554_v0  ;;  %3272 = vmatprep.subr.bf16.mxu1 %v3554_v0 }
  0x26   : > { %3174 = vmatpush3.bf16.msra.mxu0 %v3318_v6  ;;  %3280 = vmatpush3.bf16.msra.mxu1 %v3318_v6 }
  0x27   : > { %3175 = vmatprep.subr.bf16.mxu0 %v3554_v0  ;;  %3273 = vmatprep.subr.bf16.mxu1 %v3554_v0 }
  0x2a   : > { %3176 = vmatpush3.bf16.msra.mxu0 %v3319_v7  ;;  %3281 = vmatpush3.bf16.msra.mxu1 %v3319_v7 }
  0x2b   : > { %3177 = vmatprep.subr.bf16.mxu0 %v3554_v0  ;;  %3274 = vmatprep.subr.bf16.mxu1 %v3554_v0 }
  0x2e   : > { %3178 = vmatpush3.bf16.msra.mxu0 %v3320_v8  ;;  %3282 = vmatpush3.bf16.msra.mxu1 %v3320_v8 }
  0x31   : > { %3180 = vmatmul.mubr.bf16.vlgmr.msra.gmra.mrb[0].mxu0 %v3321_v9  ;;  %3196 = vmatmul.mubr.bf16.vlgmr.msra.gmra.mrb[0].mxu1 %v3323_v10 }
  0x32   : > { %3183 = vmatprep.mubr.msk.bf16.mxu0 %vm3555_vm0, %v3554_v0  ;;  %3199 = vmatprep.mubr.msk.bf16.mxu1 %vm3555_vm0, %v3554_v0 }
  0x39   : > { %3184 = vmatmul.mubr.bf16.gmra.mrb[4].mxu0 %v3322_v11  ;;  %3200 = vmatmul.mubr.bf16.gmra.mrb[4].mxu1 %v3325_v12  ;;  %v3330_v11 = vld [vmem:[%s3632_s27] ss:$44 sps:$4 sm:$0xff]   ;;  %v3332_v12 = vld [vmem:[%s3632_s27 + $0x4] ss:$44 sps:$4 sm:$0xff]  }
  0x3a   : > { %3187 = vmatprep.mubr.msk.bf16.mxu0 %vm3555_vm0, %v3554_v0  ;;  %3203 = vmatprep.mubr.msk.bf16.mxu1 %vm3555_vm0, %v3554_v0 }
  0x3b   : > { %1232 = vmatprep.subr.bf16.mxu1 %v3332_v12  ;;  %v3360_v12 = vld [vmem:[%s3632_s27 + $0x168] ss:$44 sps:$4 sm:$0xff]  }
  0x3c   : > { %1233 = vmatpush1.bf16.msra.mxu1 %v3330_v11  ;;  %v3362_v11 = vld [vmem:[%s3632_s27 + $0x16c] ss:$44 sps:$4 sm:$0xff]  }
  0x41   : > { %3188 = vmatmul.mubr.bf16.gmra.mrb[8].mxu0 %v3324_v13  ;;  %3204 = vmatmul.mubr.bf16.gmra.mrb[8].mxu1 %v3327_v14  ;;  %v3335_v13 = vld [vmem:[%s3632_s27 + $0x5c] ss:$44 sps:$4 sm:$0xff]  }
  0x42   : > { %3191 = vmatprep.mubr.msk.bf16.mxu0 %vm3555_vm0, %v3554_v0  ;;  %3207 = vmatprep.mubr.msk.bf16.mxu1 %vm3555_vm0, %v3554_v0  ;;  %v3336_v14 = vld [vmem:[%s3632_s27 + $0x8] ss:$44 sps:$4 sm:$0xff]  }
  0x43   : > { %1234 = vmatprep.subr.bf16.mxu1 %v3335_v13 }
  0x49   : > { %3192 = vmatmul.mubr.bf16.gmra.mrb[12].mxu0 %v3326_v15  ;;  %3208 = vmatmul.mubr.bf16.gmra.mrb[12].mxu1 %v3328_v16  ;;  %v3338_v15 = vld [vmem:[%s3632_s27 + $0xc] ss:$44 sps:$4 sm:$0xff]  }
  0x4a   : > { %3211 = vmatprep.mubr.msk.bf16.mxu1 %vm3555_vm0, %v3554_v0  ;;  %v3333_v16 = vld [vmem:[%s3632_s27 + $0x58] ss:$44 sps:$4 sm:$0xff]   ;;  %1355 = vmatprep.subr.bf16.mxu0 %v3338_v15 }
  0x4b   : > { %1356 = vmatpush1.bf16.msra.mxu0 %v3336_v14  ;;  %1235 = vmatpush1.bf16.msra.mxu1 %v3333_v16 }
  0x4c   : > { %1236 = vmatprep.subr.bf16.mxu1 %v3341_v18  ;;  %v3365_v18 = vld [vmem:[%s3632_s27 + $0x1c4] ss:$44 sps:$4 sm:$0xff]  }
  0x51   : > { %3212 = vmatmul.mubr.bf16.gmra.mrb[16].mxu1 %v3329_v17  ;;  %v3344_v17 = vld [vmem:[%s3632_s27 + $0x64] ss:$44 sps:$4 sm:$0xff]  }
  0x52   : > { %1357 = vmatprep.subr.bf16.mxu0 %v3344_v17  ;;  %v3359_v17 = vld [vmem:[%s3632_s27 + $0x1bc] ss:$44 sps:$4 sm:$0xff]  }
  0x53   : > { %1358 = vmatpush1.bf16.msra.mxu0 %v3342_v19 }
 0x104   : > { %v423_v20 = vpop.f32.mrb[0].mxu0  ;;  %v455_v21 = vpop.f32.mrb[0].mxu1 }
 0x105   : > { %v3181_v22 = vpop.f32.mrb[1].mxu0  ;;  %v3671_v23 = vsel %vm496_vm1, %v423_v20, -inf  ;;  %v3197_v24 = vpop.f32.mrb[1].mxu1  ;;  %v3710_v59 = vsel %vm496_vm1, %v455_v21, -inf  ;;  %v3350_v20 = vld [vmem:[%s3632_s27 + $0xbc] ss:$44 sps:$4 sm:$0xff]  }
 0x106   : > { %517 = vmax.xlane.f32.xlu0 %v3671_v23  ;;  %v426_v25 = vpop.f32.mrb[2].mxu0  ;;  %v458_v26 = vpop.f32.mrb[2].mxu1  ;;  %v3339_v21 = vld [vmem:[%s3632_s27 + $0xb0] ss:$44 sps:$4 sm:$0xff]   ;;  %v3347_v22 = vld [vmem:[%s3632_s27 + $0x10c] ss:$44 sps:$4 sm:$0xff]   ;;  %1359 = vmatprep.subr.bf16.mxu0 %v3350_v20 }
 0x107   : > { %v3182_v27 = vpop.f32.mrb[3].mxu0  ;;  %v3198_v28 = vpop.f32.mrb[3].mxu1  ;;  %v3676_v29 = vsel %vm496_vm1, %v426_v25, -inf  ;;  %v3715_v61 = vsel %vm496_vm1, %v458_v26, -inf  ;;  %v3348_v24 = vld [vmem:[%s3632_s27 + $0xb8] ss:$44 sps:$4 sm:$0xff]   ;;  %1237 = vmatpush1.bf16.msra.mxu1 %v3339_v21 }
 0x108   : > { %v3356_v25 = vld [vmem:[%s3632_s27 + $0x114] ss:$44 sps:$4 sm:$0xff]   ;;  %1238 = vmatprep.subr.bf16.mxu1 %v3347_v22  ;;  %1360 = vmatpush1.bf16.msra.mxu0 %v3348_v24  ;;  %v3353_v27 = vld [vmem:[%s3632_s27 + $0x164] ss:$44 sps:$4 sm:$0xff]  }
 0x109   : > { %v3345_v26 = vld [vmem:[%s3632_s27 + $0x108] ss:$44 sps:$4 sm:$0xff]   ;;  %v3354_v28 = vld [vmem:[%s3632_s27 + $0x110] ss:$44 sps:$4 sm:$0xff]   ;;  %1361 = vmatprep.subr.bf16.mxu0 %v3356_v25  ;;  %v3357_v20 = vld [vmem:[%s3632_s27 + $0x1b8] ss:$44 sps:$4 sm:$0xff]  }
 0x10a   : > { %519 = vmax.xlane.f32.xlu0 %v3676_v29  ;;  %v3363_v21 = vld [vmem:[%s3632_s27 + $0x1c0] ss:$44 sps:$4 sm:$0xff]  }
 0x10b   : > { %1239 = vmatpush1.bf16.msra.mxu1 %v3345_v26 }
 0x10c   : > { %v431_v30 = vpop.f32.mrb[4].mxu0  ;;  %v463_v31 = vpop.f32.mrb[4].mxu1  ;;  %1240 = vmatprep.subr.bf16.mxu1 %v3353_v27  ;;  %1362 = vmatpush1.bf16.msra.mxu0 %v3354_v28  ;;  %v3368_v27 = vld [vmem:[%s3632_s27 + $0x214] ss:$44 sps:$4 sm:$0xff]   ;;  %v3371_v28 = vld [vmem:[%s3632_s27 + $0x21c] ss:$44 sps:$4 sm:$0xff]  }
 0x10d   : > { %v3185_v32 = vpop.f32.mrb[5].mxu0  ;;  %v3681_v33 = vsel %vm496_vm1, %v431_v30, -inf  ;;  %v3201_v34 = vpop.f32.mrb[5].mxu1  ;;  %v3720_v62 = vsel %vm496_vm1, %v463_v31, -inf  ;;  %v3351_v30 = vld [vmem:[%s3632_s27 + $0x160] ss:$44 sps:$4 sm:$0xff]   ;;  %1363 = vmatprep.subr.bf16.mxu0 %v3362_v11 }
 0x10e   : > { %521 = vmax.xlane.f32.xlu1 %v3681_v33  ;;  %v434_v35 = vpop.f32.mrb[6].mxu0  ;;  %v466_v36 = vpop.f32.mrb[6].mxu1 }
 0x10f   : > { %v3186_v37 = vpop.f32.mrb[7].mxu0  ;;  %v3202_v38 = vpop.f32.mrb[7].mxu1  ;;  %v3686_v39 = vsel %vm496_vm1, %v434_v35, -inf  ;;  %v3725_v1 = vsel %vm496_vm1, %v466_v36, -inf  ;;  %1241 = vmatpush1.bf16.msra.mxu1 %v3351_v30 }
 0x110   : > { %1364 = vmatpush1.bf16.msra.mxu0 %v3360_v12  ;;  %1242 = vmatprep.subr.bf16.mxu1 %v3359_v17 }
 0x111   : > { %1365 = vmatprep.subr.bf16.mxu0 %v3365_v18 }
 0x112   : > { %523 = vmax.xlane.f32.xlu1 %v3686_v39 }
 0x113   : > { %1243 = vmatpush1.bf16.msra.mxu1 %v3357_v20  ;;  %v3389_v20 = vld [vmem:[%s3632_s27 + $0x74] ss:$44 sps:$4 sm:$0xff]  }
 0x114   : > { %v439_v40 = vpop.f32.mrb[8].mxu0  ;;  %v471_v41 = vpop.f32.mrb[8].mxu1  ;;  %1366 = vmatpush1.bf16.msra.mxu0 %v3363_v21  ;;  %1244 = vmatprep.subr.bf16.mxu1 %v3368_v27  ;;  %v3387_v21 = vld [vmem:[%s3632_s27 + $0x70] ss:$44 sps:$4 sm:$0xff]  }
 0x115   : > { %v3189_v42 = vpop.f32.mrb[9].mxu0  ;;  %v3691_v43 = vsel %vm496_vm1, %v439_v40, -inf  ;;  %v3205_v44 = vpop.f32.mrb[9].mxu1  ;;  %v3730_v4 = vsel %vm496_vm1, %v471_v41, -inf  ;;  %1367 = vmatprep.subr.bf16.mxu0 %v3371_v28 }
 0x116   : > { %525 = vmax.xlane.f32.xlu0 %v3691_v43  ;;  %v442_v45 = vpop.f32.mrb[10].mxu0  ;;  %v474_v46 = vpop.f32.mrb[10].mxu1 }
 0x117   : > { %v3190_v47 = vpop.f32.mrb[11].mxu0  ;;  %v3696_v48 = vsel %vm496_vm1, %v442_v45, -inf  ;;  %v3206_v49 = vpop.f32.mrb[11].mxu1  ;;  %v3735_v6 = vsel %vm496_vm1, %v474_v46, -inf }
 0x118   : > { %527 = vmax.xlane.f32.xlu1 %v3696_v48 }
 0x11c   : > { %v447_v50 = vpop.f32.mrb[12].mxu0  ;;  %v479_v51 = vpop.f32.mrb[12].mxu1 }
 0x11d   : > { %v3193_v52 = vpop.f32.mrb[13].mxu0  ;;  %v3701_v53 = vsel %vm496_vm1, %v447_v50, -inf  ;;  %v3209_v54 = vpop.f32.mrb[13].mxu1  ;;  %v3740_v7 = vsel %vm496_vm1, %v479_v51, -inf }
 0x11e   : > { %529 = vmax.xlane.f32.xlu0 %v3701_v53  ;;  %v450_v55 = vpop.f32.mrb[14].mxu0  ;;  %v482_v56 = vpop.f32.mrb[14].mxu1 }
 0x11f   : > { %v3194_v57 = vpop.f32.mrb[15].mxu0  ;;  %v3706_v58 = vsel %vm496_vm1, %v450_v55, -inf  ;;  %v3210_v60 = vpop.f32.mrb[15].mxu1  ;;  %v3745_v8 = vsel %vm496_vm1, %v482_v56, -inf }
 0x120   : > { %531 = vmax.xlane.f32.xlu1 %v3706_v58 }
 0x122   : > { %533 = vmax.xlane.f32.xlu0 %v3710_v59 }
 0x124   : > { %535 = vmax.xlane.f32.xlu1 %v3715_v61  ;;  %v487_v63 = vpop.f32.mrb[16].mxu1 }
 0x125   : > { %v3213_v2 = vpop.f32.mrb[17].mxu1  ;;  %v3750_v9 = vsel %vm496_vm1, %v487_v63, -inf }
 0x126   : > { %537 = vmax.xlane.f32.xlu0 %v3720_v62  ;;  %v490_v3 = vpop.f32.mrb[18].mxu1 }
 0x127   : > { %v3214_v5 = vpop.f32.mrb[19].mxu1  ;;  %v3755_v10 = vsel %vm496_vm1, %v490_v3, -inf }
 0x128   : > { %539 = vmax.xlane.f32.xlu1 %v3725_v1 }
 0x12a   : > { %541 = vmax.xlane.f32.xlu0 %v3730_v4 }
 0x12c   : > { %543 = vmax.xlane.f32.xlu1 %v3735_v6 }
 0x12e   : > { %545 = vmax.xlane.f32.xlu0 %v3740_v7 }
 0x130   : > { %547 = vmax.xlane.f32.xlu1 %v3745_v8 }
 0x132   : > { %549 = vmax.xlane.f32.xlu0 %v3750_v9 }
 0x134   : > { %551 = vmax.xlane.f32.xlu1 %v3755_v10 }
 0x193   : > { %v518_v31 = vpop.xlane.xlu0 %517 }
 0x194   : > { %v553_v32 = vsub.f32 %v3671_v23, %v518_v31  ;;  %v3366_v31 = vld [vmem:[%s3632_s27 + $0x210] ss:$44 sps:$4 sm:$0xff]  }
 0x195   : > { %1245 = vmatpush1.bf16.msra.mxu1 %v3366_v31  ;;  %v3390_v31 = vld [vmem:[%s3632_s27 + $0xc0] ss:$44 sps:$4 sm:$0xff]  }
 0x196   : > { %v571_v34 = vmul.f32 1.442695, %v553_v32  ;;  %v3369_v32 = vld [vmem:[%s3632_s27 + $0x218] ss:$44 sps:$4 sm:$0xff]  }
 0x197   : > { %v520_v35 = vpop.xlane.xlu0 %519  ;;  %1368 = vmatpush1.bf16.msra.mxu0 %v3369_v32  ;;  %v3393_v32 = vld [vmem:[%s3632_s27 + $0xc8] ss:$44 sps:$4 sm:$0xff]  }
 0x198   : > { %3458 = vpow2.f32 %v571_v34  ;;  %v554_v36 = vsub.f32 %v3676_v29, %v520_v35 }
 0x19a   : > { %v573_v37 = vmul.f32 1.442695, %v554_v36 }
 0x19b   : > { %v522_v38 = vpop.xlane.xlu1 %521 }
 0x19c   : > { %3460 = vpow2.f32 %v573_v37  ;;  %v555_v40 = vsub.f32 %v3681_v33, %v522_v38 }
 0x19e   : > { %v575_v41 = vmul.f32 1.442695, %v555_v40  ;;  %v3374_v40 = vld [vmem:[%s3632_s27 + $0x26c] ss:$44 sps:$4 sm:$0xff]  }
 0x19f   : > { %v524_v42 = vpop.xlane.xlu1 %523  ;;  %1246 = vmatprep.subr.bf16.mxu1 %v3374_v40  ;;  %v3399_v40 = vld [vmem:[%s3632_s27 + $0x120] ss:$44 sps:$4 sm:$0xff]  }
 0x1a0   : > { %3462 = vpow2.f32 %v575_v41  ;;  %v556_v44 = vsub.f32 %v3686_v39, %v524_v42  ;;  %v3377_v41 = vld [vmem:[%s3632_s27 + $0x274] ss:$44 sps:$4 sm:$0xff]  }
 0x1a1   : > { %1369 = vmatprep.subr.bf16.mxu0 %v3377_v41  ;;  %v3404_v41 = vld [vmem:[%s3632_s27 + $0x174] ss:$44 sps:$4 sm:$0xff]  }
 0x1a2   : > { %v3781_v45 = vpop.eup %3458  ;;  %v577_v46 = vmul.f32 1.442695, %v556_v44  ;;  %v3375_v44 = vld [vmem:[%s3632_s27 + $0x270] ss:$44 sps:$4 sm:$0xff]  }
 0x1a3   : > { %v526_v47 = vpop.xlane.xlu0 %525  ;;  %607 = vadd.xlane.f32.xlu0 %v3781_v45  ;;  %1370 = vmatpush1.bf16.msra.mxu0 %v3375_v44 }
 0x1a4   : > { %3464 = vpow2.f32 %v577_v46  ;;  %v557_v23 = vsub.f32 %v3691_v43, %v526_v47 }
 0x1a5   : > { %v528_v29 = vpop.xlane.xlu1 %527 }
 0x1a6   : > { %v3785_v49 = vpop.eup %3460  ;;  %v579_v50 = vmul.f32 1.442695, %v557_v23  ;;  %v558_v33 = vsub.f32 %v3696_v48, %v528_v29 }
 0x1a7   : > { %609 = vadd.xlane.f32.xlu1 %v3785_v49 }
 0x1a8   : > { %3466 = vpow2.f32 %v579_v50  ;;  %v581_v51 = vmul.f32 1.442695, %v558_v33 }
 0x1aa   : > { %v3789_v39 = vpop.eup %3462  ;;  %3468 = vpow2.f32 %v581_v51  ;;  %v3556_v51 = vmov 0  }
 0x1ab   : > { %611 = vadd.xlane.f32.xlu0 %v3789_v39  ;;  %v530_v52 = vpop.xlane.xlu0 %529  ;;  %1264 = vmatprep.mubr.bf16.mxu1 %v3556_v51 }
 0x1ac   : > { %v559_v54 = vsub.f32 %v3701_v53, %v530_v52  ;;  %1387 = vmatprep.mubr.bf16.mxu0 %v3556_v51 }
 0x1ad   : > { %v532_v43 = vpop.xlane.xlu1 %531 }
 0x1ae   : > { %v3793_v55 = vpop.eup %3464  ;;  %v583_v56 = vmul.f32 1.442695, %v559_v54  ;;  %v560_v48 = vsub.f32 %v3706_v58, %v532_v43 }
 0x1af   : > { %v534_v57 = vpop.xlane.xlu0 %533  ;;  %613 = vadd.xlane.f32.xlu1 %v3793_v55 }
 0x1b0   : > { %3470 = vpow2.f32 %v583_v56  ;;  %v585_v60 = vmul.f32 1.442695, %v560_v48  ;;  %v561_v63 = vsub.f32 %v3710_v59, %v534_v57 }
 0x1b1   : > { %v536_v2 = vpop.xlane.xlu1 %535 }
 0x1b2   : > { %v3798_v3 = vpop.eup %3466  ;;  %3472 = vpow2.f32 %v585_v60  ;;  %v587_v5 = vmul.f32 1.442695, %v561_v63  ;;  %v562_v53 = vsub.f32 %v3715_v61, %v536_v2  ;;  %v3380_v60 = vld [vmem:[%s3632_s27 + $0x14] ss:$44 sps:$4 sm:$0xff]   ;;  %v3383_v63 = vld [vmem:[%s3632_s27 + $0x1c] ss:$44 sps:$4 sm:$0xff]  }
 0x1b3   : > { %615 = vadd.xlane.f32.xlu0 %v3798_v3  ;;  %v538_v58 = vpop.xlane.xlu0 %537  ;;  %1601 = vmatprep.subr.bf16.mxu0 %v3383_v63  ;;  %v3408_v63 = vld [vmem:[%s3632_s27 + $0x1c8] ss:$44 sps:$4 sm:$0xff]  }
 0x1b4   : > { %v3804_v13 = vpop.eup %3468  ;;  %3474 = vpow2.f32 %v587_v5  ;;  %v589_v59 = vmul.f32 1.442695, %v562_v53  ;;  %v563_v14 = vsub.f32 %v3720_v62, %v538_v58 }
 0x1b5   : > { %617 = vadd.xlane.f32.xlu1 %v3804_v13  ;;  %v540_v15 = vpop.xlane.xlu1 %539 }
 0x1b6   : > { %3476 = vpow2.f32 %v589_v59  ;;  %v591_v61 = vmul.f32 1.442695, %v563_v14  ;;  %v564_v16 = vsub.f32 %v3725_v1, %v540_v15 }
 0x1b7   : > { %v542_v19 = vpop.xlane.xlu0 %541 }
 0x1b8   : > { %3478 = vpow2.f32 %v591_v61  ;;  %v593_v22 = vmul.f32 1.442695, %v564_v16  ;;  %v565_v62 = vsub.f32 %v3730_v4, %v542_v19  ;;  %v3378_v61 = vld [vmem:[%s3632_s27 + $0x10] ss:$44 sps:$4 sm:$0xff]   ;;  %v3381_v16 = vld [vmem:[%s3632_s27 + $0x18] ss:$44 sps:$4 sm:$0xff]  }
 0x1b9   : > { %v544_v24 = vpop.xlane.xlu1 %543  ;;  %v3386_v19 = vld [vmem:[%s3632_s27 + $0x6c] ss:$44 sps:$4 sm:$0xff]  }
 0x1ba   : > { %v3814_v25 = vpop.eup %3470  ;;  %3480 = vpow2.f32 %v593_v22  ;;  %v595_v1 = vmul.f32 1.442695, %v565_v62  ;;  %v566_v26 = vsub.f32 %v3735_v6, %v544_v24  ;;  %v3392_v22 = vld [vmem:[%s3632_s27 + $0xc4] ss:$44 sps:$4 sm:$0xff]   ;;  %v3395_v62 = vld [vmem:[%s3632_s27 + $0xcc] ss:$44 sps:$4 sm:$0xff]  }
 0x1bb   : > { %619 = vadd.xlane.f32.xlu0 %v3814_v25  ;;  %v546_v30 = vpop.xlane.xlu0 %545 }
 0x1bc   : > { %v3822_v4 = vpop.eup %3472  ;;  %3482 = vpow2.f32 %v595_v1  ;;  %v597_v34 = vmul.f32 1.442695, %v566_v26  ;;  %v567_v35 = vsub.f32 %v3740_v7, %v546_v30  ;;  %v3372_v7 = vld [vmem:[%s3632_s27 + $0x268] ss:$44 sps:$4 sm:$0xff]  }
 0x1bd   : > { %621 = vadd.xlane.f32.xlu1 %v3822_v4  ;;  %v548_v6 = vpop.xlane.xlu1 %547  ;;  %1247 = vmatpush1.bf16.msra.mxu1 %v3372_v7 }
 0x1be   : > { %v3826_v36 = vpop.eup %3474  ;;  %3484 = vpow2.f32 %v597_v34  ;;  %v599_v37 = vmul.f32 1.442695, %v567_v35  ;;  %v568_v38 = vsub.f32 %v3745_v8, %v548_v6  ;;  %1478 = vmatprep.subr.bf16.mxu1 %v3380_v60  ;;  %v3398_v34 = vld [vmem:[%s3632_s27 + $0x11c] ss:$44 sps:$4 sm:$0xff]   ;;  %v3401_v35 = vld [vmem:[%s3632_s27 + $0x124] ss:$44 sps:$4 sm:$0xff]  }
 0x1bf   : > { %623 = vadd.xlane.f32.xlu0 %v3826_v36  ;;  %v550_v42 = vpop.xlane.xlu0 %549 }
 0x1c0   : > { %v3834_v46 = vpop.eup %3476  ;;  %3486 = vpow2.f32 %v599_v37  ;;  %v601_v47 = vmul.f32 1.442695, %v568_v38  ;;  %v569_v23 = vsub.f32 %v3750_v9, %v550_v42  ;;  %v3396_v38 = vld [vmem:[%s3632_s27 + $0x118] ss:$44 sps:$4 sm:$0xff]   ;;  %v3407_v42 = vld [vmem:[%s3632_s27 + $0x17c] ss:$44 sps:$4 sm:$0xff]  }
 0x1c1   : > { %625 = vadd.xlane.f32.xlu1 %v3834_v46  ;;  %v552_v29 = vpop.xlane.xlu1 %551 }
 0x1c2   : > { %v3838_v8 = vpop.eup %3478  ;;  %3488 = vpow2.f32 %v601_v47  ;;  %v603_v50 = vmul.f32 1.442695, %v569_v23  ;;  %v570_v33 = vsub.f32 %v3755_v10, %v552_v29  ;;  %v3405_v23 = vld [vmem:[%s3632_s27 + $0x178] ss:$44 sps:$4 sm:$0xff]  }
 0x1c3   : > { %627 = vadd.xlane.f32.xlu0 %v3838_v8  ;;  %v3410_v29 = vld [vmem:[%s3632_s27 + $0x1cc] ss:$44 sps:$4 sm:$0xff]  }
 0x1c4   : > { %v3843_v52 = vpop.eup %3480  ;;  %3490 = vpow2.f32 %v603_v50  ;;  %v605_v9 = vmul.f32 1.442695, %v570_v33  ;;  %v3413_v50 = vld [vmem:[%s3632_s27 + $0x1d4] ss:$44 sps:$4 sm:$0xff]  }
 0x1c5   : > { %629 = vadd.xlane.f32.xlu1 %v3843_v52 }
 0x1c6   : > { %v3847_v54 = vpop.eup %3482  ;;  %3492 = vpow2.f32 %v605_v9 }
 0x1c7   : > { %631 = vadd.xlane.f32.xlu0 %v3847_v54 }
 0x1c8   : > { %v3850_v10 = vpop.eup %3484 }
 0x1c9   : > { %633 = vadd.xlane.f32.xlu1 %v3850_v10 }
 0x1ca   : > { %v3853_v43 = vpop.eup %3486 }
 0x1cb   : > { %635 = vadd.xlane.f32.xlu0 %v3853_v43 }
 0x1cc   : > { %v3856_v56 = vpop.eup %3488 }
 0x1cd   : > { %637 = vadd.xlane.f32.xlu1 %v3856_v56 }
 0x1ce   : > { %v3859_v48 = vpop.eup %3490 }
 0x1cf   : > { %639 = vadd.xlane.f32.xlu0 %v3859_v48 }
 0x1d0   : > { %v3862_v57 = vpop.eup %3492 }
 0x1d1   : > { %641 = vadd.xlane.f32.xlu1 %v3862_v57 }
 0x230   : > { %v608_v2 = vpop.xlane.xlu0 %607 }
 0x231   : > { %3494 = vrcp.f32 %v608_v2  ;;  %v3411_v2 = vld [vmem:[%s3632_s27 + $0x1d0] ss:$44 sps:$4 sm:$0xff]  }
 0x234   : > { %v610_v5 = vpop.xlane.xlu1 %609 }
 0x235   : > { %3496 = vrcp.f32 %v610_v5  ;;  %v3416_v5 = vld [vmem:[%s3632_s27 + $0x224] ss:$44 sps:$4 sm:$0xff]  }
 0x238   : > { %v612_v53 = vpop.xlane.xlu0 %611 }
 0x239   : > { %3498 = vrcp.f32 %v612_v53  ;;  %v3419_v53 = vld [vmem:[%s3632_s27 + $0x22c] ss:$44 sps:$4 sm:$0xff]  }
 0x23b   : > { %v3495_v58 = vpop.eup %3494 }
 0x23c   : > { %v614_v11 = vpop.xlane.xlu1 %613  ;;  %v661_v59 = vmul.f32 %v3495_v58, %v3781_v45 }
 0x23d   : > { %3500 = vrcp.f32 %v614_v11 }
 0x23f   : > { %v3497_v12 = vpop.eup %3496 }
 0x240   : > { %v662_v14 = vmul.f32 %v3497_v12, %v3785_v49  ;;  %v616_v15 = vpop.xlane.xlu0 %615  ;;  %v3384_v49 = vld [vmem:[%s3632_s27 + $0x68] ss:$44 sps:$4 sm:$0xff]  }
 0x241   : > { %3502 = vrcp.f32 %v616_v15  ;;  %v3422_v15 = vld [vmem:[%s3632_s27 + $0x27c] ss:$44 sps:$4 sm:$0xff]  }
 0x242   : > { %v3871_v17 = vpack.c.bf16 %v662_v14, %v661_v59  ;;  %v618_v18 = vpop.xlane.xlu1 %617  ;;  %v3417_v59 = vld [vmem:[%s3632_s27 + $0x228] ss:$44 sps:$4 sm:$0xff]  }
 0x243   : > { %3504 = vrcp.f32 %v618_v18  ;;  %v3499_v45 = vpop.eup %3498 }
 0x244   : > { %1265 = vmatmul.mubr.bf16.vlgmr.msra.gmra.mrb[20].mxu1 %v3871_v17  ;;  %1388 = vmatmul.mubr.bf16.vlgmr.msra.gmra.mrb[16].mxu0 %v3871_v17  ;;  %v663_v1 = vmul.f32 %v3499_v45, %v3789_v39  ;;  %v3428_v45 = vld [vmem:[%s3632_s27 + $0x24] ss:$44 sps:$4 sm:$0xff]  }
 0x245   : > { %1479 = vmatpush1.bf16.msra.mxu1 %v3378_v61  ;;  %1602 = vmatpush1.bf16.msra.mxu0 %v3381_v16  ;;  %v3425_v61 = vld [vmem:[%s3632_s27 + $0x284] ss:$44 sps:$4 sm:$0xff]  }
 0x246   : > { %1274 = vmatprep.mubr.bf16.mxu1 %v3556_v51  ;;  %1397 = vmatprep.mubr.bf16.mxu0 %v3556_v51 }
 0x247   : > { %v3501_v24 = vpop.eup %3500  ;;  %1480 = vmatprep.subr.bf16.mxu1 %v3386_v19  ;;  %1603 = vmatprep.subr.bf16.mxu0 %v3389_v20  ;;  %v3420_v19 = vld [vmem:[%s3632_s27 + $0x278] ss:$44 sps:$4 sm:$0xff]   ;;  %v3423_v20 = vld [vmem:[%s3632_s27 + $0x280] ss:$44 sps:$4 sm:$0xff]  }
 0x248   : > { %v664_v26 = vmul.f32 %v3501_v24, %v3793_v55  ;;  %v620_v27 = vpop.xlane.xlu0 %619 }
 0x249   : > { %1481 = vmatpush1.bf16.msra.mxu1 %v3384_v49  ;;  %1604 = vmatpush1.bf16.msra.mxu0 %v3387_v21  ;;  %3506 = vrcp.f32 %v620_v27 }
 0x24a   : > { %v3885_v28 = vpack.c.bf16 %v664_v26, %v663_v1  ;;  %v622_v30 = vpop.xlane.xlu1 %621  ;;  %1482 = vmatprep.subr.bf16.mxu1 %v3392_v22  ;;  %1605 = vmatprep.subr.bf16.mxu0 %v3395_v62 }
 0x24b   : > { %3508 = vrcp.f32 %v622_v30  ;;  %v3503_v39 = vpop.eup %3502 }
 0x24c   : > { %1275 = vmatmul.mubr.bf16.gmra.mrb[24].mxu1 %v3885_v28  ;;  %1398 = vmatmul.mubr.bf16.gmra.mrb[20].mxu0 %v3885_v28  ;;  %v665_v7 = vmul.f32 %v3503_v39, %v3798_v3  ;;  %v624_v44 = vpop.xlane.xlu0 %623 }
 0x24d   : > { %v3505_v55 = vpop.eup %3504  ;;  %1284 = vmatprep.mubr.bf16.mxu1 %v3556_v51  ;;  %1407 = vmatprep.mubr.bf16.mxu0 %v3556_v51 }
 0x24e   : > { %v666_v6 = vmul.f32 %v3505_v55, %v3804_v13  ;;  %v626_v37 = vpop.xlane.xlu1 %625  ;;  %1483 = vmatpush1.bf16.msra.mxu1 %v3390_v31  ;;  %1606 = vmatpush1.bf16.msra.mxu0 %v3393_v32  ;;  %v3402_v13 = vld [vmem:[%s3632_s27 + $0x170] ss:$44 sps:$4 sm:$0xff]  }
 0x24f   : > { %1484 = vmatprep.subr.bf16.mxu1 %v3398_v34  ;;  %1607 = vmatprep.subr.bf16.mxu0 %v3401_v35  ;;  %3510 = vrcp.f32 %v626_v37 }
 0x250   : > { %v3901_v47 = vpack.c.bf16 %v666_v6, %v665_v7  ;;  %3512 = vrcp.f32 %v624_v44  ;;  %v628_v58 = vpop.xlane.xlu0 %627  ;;  %v3432_v7 = vld [vmem:[%s3632_s27 + $0x7c] ss:$44 sps:$4 sm:$0xff]   ;;  %v3436_v44 = vld [vmem:[%s3632_s27 + $0xd4] ss:$44 sps:$4 sm:$0xff]  }
 0x252   : > { %1485 = vmatpush1.bf16.msra.mxu1 %v3396_v38  ;;  %1608 = vmatpush1.bf16.msra.mxu0 %v3399_v40  ;;  %v630_v60 = vpop.xlane.xlu1 %629 }
 0x253   : > { %1486 = vmatprep.subr.bf16.mxu1 %v3404_v41  ;;  %1609 = vmatprep.subr.bf16.mxu0 %v3407_v42  ;;  %v3507_v33 = vpop.eup %3506  ;;  %3514 = vrcp.f32 %v630_v60  ;;  %v3426_v41 = vld [vmem:[%s3632_s27 + $0x20] ss:$44 sps:$4 sm:$0xff]   ;;  %v3429_v42 = vld [vmem:[%s3632_s27 + $0x28] ss:$44 sps:$4 sm:$0xff]  }
 0x254   : > { %1285 = vmatmul.mubr.bf16.gmra.mrb[28].mxu1 %v3901_v47  ;;  %1408 = vmatmul.mubr.bf16.gmra.mrb[24].mxu0 %v3901_v47  ;;  %v667_v11 = vmul.f32 %v3507_v33, %v3814_v25  ;;  %3516 = vrcp.f32 %v628_v58  ;;  %v632_v21 = vpop.xlane.xlu0 %631  ;;  %v3441_v33 = vld [vmem:[%s3632_s27 + $0x130] ss:$44 sps:$4 sm:$0xff]   ;;  %v3445_v60 = vld [vmem:[%s3632_s27 + $0x188] ss:$44 sps:$4 sm:$0xff]   ;;  %v3453_v58 = vld [vmem:[%s3632_s27 + $0x238] ss:$44 sps:$4 sm:$0xff]  }
 0x255   : > { %v3509_v3 = vpop.eup %3508  ;;  %1294 = vmatprep.mubr.bf16.mxu1 %v3556_v51  ;;  %1417 = vmatprep.mubr.bf16.mxu0 %v3556_v51 }
 0x256   : > { %v668_v9 = vmul.f32 %v3509_v3, %v3822_v4  ;;  %1487 = vmatpush1.bf16.msra.mxu1 %v3402_v13  ;;  %1610 = vmatpush1.bf16.msra.mxu0 %v3405_v23  ;;  %v3414_v4 = vld [vmem:[%s3632_s27 + $0x220] ss:$44 sps:$4 sm:$0xff]   ;;  %v634_v18 = vpop.xlane.xlu1 %633  ;;  %v3434_v13 = vld [vmem:[%s3632_s27 + $0xd0] ss:$44 sps:$4 sm:$0xff]   ;;  %v3437_v23 = vld [vmem:[%s3632_s27 + $0xd8] ss:$44 sps:$4 sm:$0xff]  }
 0x257   : > { %1488 = vmatprep.subr.bf16.mxu1 %v3410_v29  ;;  %1611 = vmatprep.subr.bf16.mxu0 %v3413_v50  ;;  %3518 = vrcp.f32 %v634_v18  ;;  %v3440_v29 = vld [vmem:[%s3632_s27 + $0x12c] ss:$44 sps:$4 sm:$0xff]   ;;  %v3438_v50 = vld [vmem:[%s3632_s27 + $0x128] ss:$44 sps:$4 sm:$0xff]   ;;  %v3444_v3 = vld [vmem:[%s3632_s27 + $0x184] ss:$44 sps:$4 sm:$0xff]  }
 0x258   : > { %v3917_v12 = vpack.c.bf16 %v668_v9, %v667_v11  ;;  %3520 = vrcp.f32 %v632_v21  ;;  %v636_v26 = vpop.xlane.xlu0 %635  ;;  %v3442_v9 = vld [vmem:[%s3632_s27 + $0x180] ss:$44 sps:$4 sm:$0xff]   ;;  %v3450_v11 = vld [vmem:[%s3632_s27 + $0x230] ss:$44 sps:$4 sm:$0xff]  }
 0x259   : > { %v3511_v14 = vpop.eup %3510 }
 0x25a   : > { %1489 = vmatpush1.bf16.msra.mxu1 %v3408_v63  ;;  %1612 = vmatpush1.bf16.msra.mxu0 %v3411_v2  ;;  %v3513_v25 = vpop.eup %3512  ;;  %v670_v16 = vmul.f32 %v3511_v14, %v3834_v46  ;;  %v638_v24 = vpop.xlane.xlu1 %637  ;;  %v3448_v63 = vld [vmem:[%s3632_s27 + $0x1dc] ss:$44 sps:$4 sm:$0xff]   ;;  %v3446_v2 = vld [vmem:[%s3632_s27 + $0x1d8] ss:$44 sps:$4 sm:$0xff]  }
 0x25b   : > { %1490 = vmatprep.subr.bf16.mxu1 %v3416_v5  ;;  %1613 = vmatprep.subr.bf16.mxu0 %v3419_v53  ;;  %v669_v49 = vmul.f32 %v3513_v25, %v3826_v36  ;;  %3522 = vrcp.f32 %v638_v24  ;;  %v3449_v5 = vld [vmem:[%s3632_s27 + $0x1e0] ss:$44 sps:$4 sm:$0xff]   ;;  %v3457_v14 = vld [vmem:[%s3632_s27 + $0x290] ss:$44 sps:$4 sm:$0xff]  }
 0x25c   : > { %1295 = vmatmul.mubr.bf16.gmra.mrb[32].mxu1 %v3917_v12  ;;  %1418 = vmatmul.mubr.bf16.gmra.mrb[28].mxu0 %v3917_v12  ;;  %3524 = vrcp.f32 %v636_v26  ;;  %v640_v34 = vpop.xlane.xlu0 %639  ;;  %v3452_v53 = vld [vmem:[%s3632_s27 + $0x234] ss:$44 sps:$4 sm:$0xff]  }
 0x25d   : > { %1304 = vmatprep.mubr.bf16.mxu1 %v3556_v51  ;;  %1427 = vmatprep.mubr.bf16.mxu0 %v3556_v51  ;;  %v3932_v22 = vpack.c.bf16 %v670_v16, %v669_v49  ;;  %v3515_v62 = vpop.eup %3514 }
 0x25e   : > { %1491 = vmatpush1.bf16.msra.mxu1 %v3414_v4  ;;  %1614 = vmatpush1.bf16.msra.mxu0 %v3417_v59  ;;  %v3517_v46 = vpop.eup %3516  ;;  %v672_v36 = vmul.f32 %v3515_v62, %v3843_v52  ;;  %v642_v32 = vpop.xlane.xlu1 %641  ;;  %v3456_v4 = vld [vmem:[%s3632_s27 + $0x28c] ss:$44 sps:$4 sm:$0xff]   ;;  %v3454_v59 = vld [vmem:[%s3632_s27 + $0x288] ss:$44 sps:$4 sm:$0xff]  }
 0x25f   : > { %1492 = vmatprep.subr.bf16.mxu1 %v3422_v15  ;;  %1615 = vmatprep.subr.bf16.mxu0 %v3425_v61  ;;  %v671_v1 = vmul.f32 %v3517_v46, %v3838_v8  ;;  %3526 = vrcp.f32 %v642_v32 }
 0x260   : > { %3528 = vrcp.f32 %v640_v34 }
 0x261   : > { %v3941_v27 = vpack.c.bf16 %v672_v36, %v671_v1  ;;  %v3519_v30 = vpop.eup %3518 }
 0x262   : > { %1493 = vmatpush1.bf16.msra.mxu1 %v3420_v19  ;;  %1616 = vmatpush1.bf16.msra.mxu0 %v3423_v20  ;;  %v3521_v31 = vpop.eup %3520  ;;  %v674_v52 = vmul.f32 %v3519_v30, %v3850_v10 }
 0x263   : > { %1724 = vmatprep.subr.bf16.mxu1 %v3428_v45  ;;  %3215 = vmatprep.subr.bf16.mxu0 %v3554_v0  ;;  %v673_v8 = vmul.f32 %v3521_v31, %v3847_v54 }
 0x264   : > { %1305 = vmatmul.mubr.bf16.gmra.mrb[36].mxu1 %v3932_v22  ;;  %1428 = vmatmul.mubr.bf16.gmra.mrb[32].mxu0 %v3932_v22 }
 0x265   : > { %1314 = vmatprep.mubr.bf16.mxu1 %v3556_v51  ;;  %1437 = vmatprep.mubr.bf16.mxu0 %v3556_v51  ;;  %v3949_v35 = vpack.c.bf16 %v674_v52, %v673_v8  ;;  %v3523_v39 = vpop.eup %3522 }
 0x266   : > { %v3525_v55 = vpop.eup %3524  ;;  %v676_v10 = vmul.f32 %v3523_v39, %v3856_v56 }
 0x267   : > { %v675_v54 = vmul.f32 %v3525_v55, %v3853_v43 }
 0x269   : > { %v3957_v6 = vpack.c.bf16 %v676_v10, %v675_v54  ;;  %v3527_v37 = vpop.eup %3526 }
 0x26a   : > { %v3529_v38 = vpop.eup %3528  ;;  %v678_v56 = vmul.f32 %v3527_v37, %v3862_v57  ;;  %v3433_v57 = vld [vmem:[%s3632_s27 + $0x80] ss:$44 sps:$4 sm:$0xff]  }
 0x26b   : > { %v677_v43 = vmul.f32 %v3529_v38, %v3859_v48  ;;  %v3430_v48 = vld [vmem:[%s3632_s27 + $0x78] ss:$44 sps:$4 sm:$0xff]  }
 0x26c   : > { %1315 = vmatmul.mubr.bf16.gmra.mrb[40].mxu1 %v3941_v27  ;;  %1438 = vmatmul.mubr.bf16.gmra.mrb[36].mxu0 %v3941_v27 }
 0x26d   : > { %1324 = vmatprep.mubr.bf16.mxu1 %v3556_v51  ;;  %1447 = vmatprep.mubr.bf16.mxu0 %v3556_v51  ;;  %v3965_v40 = vpack.c.bf16 %v678_v56, %v677_v43 }
 0x274   : > { %1325 = vmatmul.mubr.bf16.gmra.mrb[44].mxu1 %v3949_v35  ;;  %1448 = vmatmul.mubr.bf16.gmra.mrb[40].mxu0 %v3949_v35 }
 0x275   : > { %1334 = vmatprep.mubr.bf16.mxu1 %v3556_v51  ;;  %1457 = vmatprep.mubr.bf16.mxu0 %v3556_v51 }
 0x27c   : > { %1335 = vmatmul.mubr.bf16.gmra.mrb[48].mxu1 %v3957_v6  ;;  %1458 = vmatmul.mubr.bf16.gmra.mrb[44].mxu0 %v3957_v6 }
 0x27d   : > { %1344 = vmatprep.mubr.bf16.mxu1 %v3556_v51  ;;  %1467 = vmatprep.mubr.bf16.mxu0 %v3556_v51 }
 0x284   : > { %1345 = vmatmul.mubr.bf16.gmra.mrb[52].mxu1 %v3965_v40  ;;  %1468 = vmatmul.mubr.bf16.gmra.mrb[48].mxu0 %v3965_v40 }
 0x285   : > { %1510 = vmatprep.mubr.bf16.mxu1 %v3556_v51  ;;  %1633 = vmatprep.mubr.bf16.mxu0 %v3556_v51 }
 0x28c   : > { %1511 = vmatmul.mubr.bf16.vlgmr.msra.gmra.mrb[56].mxu1 %v3871_v17  ;;  %1634 = vmatmul.mubr.bf16.vlgmr.msra.gmra.mrb[52].mxu0 %v3871_v17 }
 0x28d   : > { %1725 = vmatpush1.bf16.msra.mxu1 %v3426_v41  ;;  %3216 = vmatpush3.bf16.msra.mxu0 %v3429_v42 }
 0x28e   : > { %1520 = vmatprep.mubr.bf16.mxu1 %v3556_v51  ;;  %1643 = vmatprep.mubr.bf16.mxu0 %v3556_v51 }
 0x28f   : > { %1726 = vmatprep.subr.bf16.mxu1 %v3432_v7  ;;  %3217 = vmatprep.subr.bf16.mxu0 %v3554_v0 }
 0x291   : > { %1727 = vmatpush1.bf16.msra.mxu1 %v3430_v48  ;;  %3218 = vmatpush3.bf16.msra.mxu0 %v3433_v57 }
 0x292   : > { %1728 = vmatprep.subr.bf16.mxu1 %v3436_v44  ;;  %3219 = vmatprep.subr.bf16.mxu0 %v3554_v0 }
 0x294   : > { %1521 = vmatmul.mubr.bf16.gmra.mrb[60].mxu1 %v3885_v28  ;;  %1644 = vmatmul.mubr.bf16.gmra.mrb[56].mxu0 %v3885_v28 }
 0x295   : > { %1530 = vmatprep.mubr.bf16.mxu1 %v3556_v51  ;;  %1653 = vmatprep.mubr.bf16.mxu0 %v3556_v51 }
 0x296   : > { %1729 = vmatpush1.bf16.msra.mxu1 %v3434_v13  ;;  %3220 = vmatpush3.bf16.msra.mxu0 %v3437_v23 }
 0x297   : > { %1730 = vmatprep.subr.bf16.mxu1 %v3440_v29  ;;  %3221 = vmatprep.subr.bf16.mxu0 %v3554_v0 }
 0x29a   : > { %1731 = vmatpush1.bf16.msra.mxu1 %v3438_v50  ;;  %3222 = vmatpush3.bf16.msra.mxu0 %v3441_v33 }
 0x29b   : > { %1732 = vmatprep.subr.bf16.mxu1 %v3444_v3  ;;  %3223 = vmatprep.subr.bf16.mxu0 %v3554_v0 }
 0x29c   : > { %1531 = vmatmul.mubr.bf16.gmra.mrb[64].mxu1 %v3901_v47  ;;  %1654 = vmatmul.mubr.bf16.gmra.mrb[60].mxu0 %v3901_v47 }
 0x29d   : > { %1540 = vmatprep.mubr.bf16.mxu1 %v3556_v51  ;;  %1663 = vmatprep.mubr.bf16.mxu0 %v3556_v51 }
 0x29e   : > { %1733 = vmatpush1.bf16.msra.mxu1 %v3442_v9  ;;  %3224 = vmatpush3.bf16.msra.mxu0 %v3445_v60 }
 0x29f   : > { %1734 = vmatprep.subr.bf16.mxu1 %v3448_v63  ;;  %3225 = vmatprep.subr.bf16.mxu0 %v3554_v0 }
 0x2a2   : > { %1735 = vmatpush1.bf16.msra.mxu1 %v3446_v2  ;;  %3226 = vmatpush3.bf16.msra.mxu0 %v3449_v5 }
 0x2a3   : > { %1736 = vmatprep.subr.bf16.mxu1 %v3452_v53  ;;  %3227 = vmatprep.subr.bf16.mxu0 %v3554_v0 }
 0x2a4   : > { %1541 = vmatmul.mubr.bf16.gmra.mrb[68].mxu1 %v3917_v12  ;;  %1664 = vmatmul.mubr.bf16.gmra.mrb[64].mxu0 %v3917_v12 }
 0x2a5   : > { %1550 = vmatprep.mubr.bf16.mxu1 %v3556_v51  ;;  %1673 = vmatprep.mubr.bf16.mxu0 %v3556_v51 }
 0x2a6   : > { %1737 = vmatpush1.bf16.msra.mxu1 %v3450_v11  ;;  %3228 = vmatpush3.bf16.msra.mxu0 %v3453_v58 }
 0x2a7   : > { %1738 = vmatprep.subr.bf16.mxu1 %v3456_v4  ;;  %3229 = vmatprep.subr.bf16.mxu0 %v3554_v0 }
 0x2aa   : > { %1739 = vmatpush1.bf16.msra.mxu1 %v3454_v59  ;;  %3230 = vmatpush3.bf16.msra.mxu0 %v3457_v14 }
 0x2ac   : > { %1551 = vmatmul.mubr.bf16.gmra.mrb[72].mxu1 %v3932_v22  ;;  %1674 = vmatmul.mubr.bf16.gmra.mrb[68].mxu0 %v3932_v22 }
 0x2ad   : > { %1560 = vmatprep.mubr.bf16.mxu1 %v3556_v51  ;;  %1683 = vmatprep.mubr.bf16.mxu0 %v3556_v51 }
 0x2b4   : > { %1561 = vmatmul.mubr.bf16.gmra.mrb[76].mxu1 %v3941_v27  ;;  %1684 = vmatmul.mubr.bf16.gmra.mrb[72].mxu0 %v3941_v27 }
 0x2b5   : > { %1570 = vmatprep.mubr.bf16.mxu1 %v3556_v51  ;;  %1693 = vmatprep.mubr.bf16.mxu0 %v3556_v51 }
 0x2bc   : > { %1571 = vmatmul.mubr.bf16.gmra.mrb[80].mxu1 %v3949_v35  ;;  %1694 = vmatmul.mubr.bf16.gmra.mrb[76].mxu0 %v3949_v35 }
 0x2bd   : > { %1580 = vmatprep.mubr.bf16.mxu1 %v3556_v51  ;;  %1703 = vmatprep.mubr.bf16.mxu0 %v3556_v51 }
 0x2c4   : > { %1581 = vmatmul.mubr.bf16.gmra.mrb[84].mxu1 %v3957_v6  ;;  %1704 = vmatmul.mubr.bf16.gmra.mrb[80].mxu0 %v3957_v6 }
 0x2c5   : > { %1590 = vmatprep.mubr.bf16.mxu1 %v3556_v51  ;;  %1713 = vmatprep.mubr.bf16.mxu0 %v3556_v51 }
 0x2cc   : > { %1591 = vmatmul.mubr.bf16.gmra.mrb[88].mxu1 %v3965_v40  ;;  %1714 = vmatmul.mubr.bf16.gmra.mrb[84].mxu0 %v3965_v40 }
 0x2cd   : > { %1756 = vmatprep.mubr.bf16.mxu1 %v3556_v51  ;;  %3231 = vmatprep.mubr.msk.bf16.mxu0 %vm3555_vm0, %v3554_v0 }
 0x2d4   : > { %1757 = vmatmul.mubr.bf16.vlgmr.msra.gmra.mrb[92].mxu1 %v3871_v17  ;;  %3232 = vmatmul.mubr.bf16.vlgmr.msra.gmra.mrb[88].mxu0 %v3871_v17 }
 0x2d5   : > { %1766 = vmatprep.mubr.bf16.mxu1 %v3556_v51  ;;  %3235 = vmatprep.mubr.msk.bf16.mxu0 %vm3555_vm0, %v3554_v0 }
 0x2dc   : > { %1767 = vmatmul.mubr.bf16.gmra.mrb[96].mxu1 %v3885_v28  ;;  %3236 = vmatmul.mubr.bf16.gmra.mrb[92].mxu0 %v3885_v28 }
 0x2dd   : > { %1776 = vmatprep.mubr.bf16.mxu1 %v3556_v51  ;;  %3239 = vmatprep.mubr.msk.bf16.mxu0 %vm3555_vm0, %v3554_v0 }
 0x2e4   : > { %1777 = vmatmul.mubr.bf16.gmra.mrb[100].mxu1 %v3901_v47  ;;  %3240 = vmatmul.mubr.bf16.gmra.mrb[96].mxu0 %v3901_v47 }
 0x2e5   : > { %1786 = vmatprep.mubr.bf16.mxu1 %v3556_v51  ;;  %3243 = vmatprep.mubr.msk.bf16.mxu0 %vm3555_vm0, %v3554_v0 }
 0x2ec   : > { %1787 = vmatmul.mubr.bf16.gmra.mrb[104].mxu1 %v3917_v12  ;;  %3244 = vmatmul.mubr.bf16.gmra.mrb[100].mxu0 %v3917_v12 }
 0x2ed   : > { %1796 = vmatprep.mubr.bf16.mxu1 %v3556_v51  ;;  %3247 = vmatprep.mubr.msk.bf16.mxu0 %vm3555_vm0, %v3554_v0 }
 0x2f4   : > { %1797 = vmatmul.mubr.bf16.gmra.mrb[108].mxu1 %v3932_v22  ;;  %3248 = vmatmul.mubr.bf16.gmra.mrb[104].mxu0 %v3932_v22 }
 0x2f5   : > { %1806 = vmatprep.mubr.bf16.mxu1 %v3556_v51  ;;  %3251 = vmatprep.mubr.msk.bf16.mxu0 %vm3555_vm0, %v3554_v0 }
 0x2fc   : > { %1807 = vmatmul.mubr.bf16.gmra.mrb[112].mxu1 %v3941_v27  ;;  %3252 = vmatmul.mubr.bf16.gmra.mrb[108].mxu0 %v3941_v27 }
 0x2fd   : > { %1816 = vmatprep.mubr.bf16.mxu1 %v3556_v51  ;;  %3255 = vmatprep.mubr.msk.bf16.mxu0 %vm3555_vm0, %v3554_v0 }
 0x304   : > { %1817 = vmatmul.mubr.bf16.gmra.mrb[116].mxu1 %v3949_v35  ;;  %3256 = vmatmul.mubr.bf16.gmra.mrb[112].mxu0 %v3949_v35 }
 0x305   : > { %1826 = vmatprep.mubr.bf16.mxu1 %v3556_v51  ;;  %3259 = vmatprep.mubr.msk.bf16.mxu0 %vm3555_vm0, %v3554_v0 }
 0x30c   : > { %1827 = vmatmul.mubr.bf16.gmra.mrb[120].mxu1 %v3957_v6  ;;  %3260 = vmatmul.mubr.bf16.gmra.mrb[116].mxu0 %v3957_v6 }
 0x30d   : > { %1836 = vmatprep.mubr.bf16.mxu1 %v3556_v51  ;;  %3263 = vmatprep.mubr.msk.bf16.mxu0 %vm3555_vm0, %v3554_v0 }
 0x314   : > { %1837 = vmatmul.mubr.bf16.gmra.mrb[124].mxu1 %v3965_v40  ;;  %3264 = vmatmul.mubr.bf16.gmra.mrb[120].mxu0 %v3965_v40 }
 0x317   : > { %v1266_v17 = vpop.f32.mrb[20].mxu1  ;;  %v1389_v28 = vpop.f32.mrb[16].mxu0 }
 0x318   : > { %v1268_v51 = vpop.f32.mrb[21].mxu1  ;;  %v1391_v47 = vpop.f32.mrb[17].mxu0 }
 0x319   : > { %v3021_v12 = vpack.c.bf16 %v1268_v51, %v1266_v17  ;;  %v3022_v0 = vpack.c.bf16 %v1391_v47, %v1389_v28  ;;  %v1270_v15 = vpop.f32.mrb[22].mxu1  ;;  %v1393_v61 = vpop.f32.mrb[18].mxu0 }
 0x31a   : > { %v1272_v25 = vpop.f32.mrb[23].mxu1  ;;  %v1395_v16 = vpop.f32.mrb[19].mxu0 }
 0x31b   : > { %2564 = vst [vmem:[%s4084_s4] sm:$0xff] %v3021_v12  ;;  %2565 = vst [vmem:[%s4084_s4 + $0x8] sm:$0xff] %v3022_v0  ;;  %v3027_v18 = vpack.c.bf16 %v1272_v25, %v1270_v15  ;;  %v3028_v19 = vpack.c.bf16 %v1395_v16, %v1393_v61 }
 0x31d   : > { %2570 = vst [vmem:[%s4084_s4 + $0x2c] sm:$0xff] %v3027_v18  ;;  %2571 = vst [vmem:[%s4084_s4 + $0x34] sm:$0xff] %v3028_v19 }
 0x31f   : > { %v1276_v20 = vpop.f32.mrb[24].mxu1  ;;  %v1399_v45 = vpop.f32.mrb[20].mxu0 }
 0x320   : > { %v1278_v49 = vpop.f32.mrb[25].mxu1  ;;  %v1401_v21 = vpop.f32.mrb[21].mxu0 }
 0x321   : > { %v3033_v22 = vpack.c.bf16 %v1278_v49, %v1276_v20  ;;  %v3034_v62 = vpack.c.bf16 %v1401_v21, %v1399_v45  ;;  %v1280_v46 = vpop.f32.mrb[26].mxu1  ;;  %v1403_v36 = vpop.f32.mrb[22].mxu0 }
 0x322   : > { %v1282_v24 = vpop.f32.mrb[27].mxu1  ;;  %v1405_v1 = vpop.f32.mrb[23].mxu0 }
 0x323   : > { %2576 = vst [vmem:[%s4084_s4 + $0x58] sm:$0xff] %v3033_v22  ;;  %2577 = vst [vmem:[%s4084_s4 + $0x60] sm:$0xff] %v3034_v62  ;;  %v3039_v26 = vpack.c.bf16 %v1282_v24, %v1280_v46  ;;  %v3040_v27 = vpack.c.bf16 %v1405_v1, %v1403_v36 }
 0x325   : > { %2582 = vst [vmem:[%s4084_s4 + $0x84] sm:$0xff] %v3039_v26  ;;  %2583 = vst [vmem:[%s4084_s4 + $0x8c] sm:$0xff] %v3040_v27 }
 0x327   : > { %v1286_v30 = vpop.f32.mrb[28].mxu1  ;;  %v1409_v31 = vpop.f32.mrb[24].mxu0 }
 0x328   : > { %v1288_v52 = vpop.f32.mrb[29].mxu1  ;;  %v1411_v32 = vpop.f32.mrb[25].mxu0 }
 0x329   : > { %v3045_v8 = vpack.c.bf16 %v1288_v52, %v1286_v30  ;;  %v3046_v34 = vpack.c.bf16 %v1411_v32, %v1409_v31  ;;  %v1290_v35 = vpop.f32.mrb[30].mxu1  ;;  %v1413_v39 = vpop.f32.mrb[26].mxu0 }
 0x32a   : > { %v1292_v55 = vpop.f32.mrb[31].mxu1  ;;  %v1415_v10 = vpop.f32.mrb[27].mxu0 }
 0x32b   : > { %2588 = vst [vmem:[%s4084_s4 + $0xb0] sm:$0xff] %v3045_v8  ;;  %2589 = vst [vmem:[%s4084_s4 + $0xb8] sm:$0xff] %v3046_v34  ;;  %v3051_v54 = vpack.c.bf16 %v1292_v55, %v1290_v35  ;;  %v3052_v6 = vpack.c.bf16 %v1415_v10, %v1413_v39 }
 0x32d   : > { %2594 = vst [vmem:[%s4084_s4 + $0xdc] sm:$0xff] %v3051_v54  ;;  %2595 = vst [vmem:[%s4084_s4 + $0xe4] sm:$0xff] %v3052_v6 }
 0x32f   : > { %v1296_v37 = vpop.f32.mrb[32].mxu1  ;;  %v1419_v38 = vpop.f32.mrb[28].mxu0 }
 0x330   : > { %v1298_v56 = vpop.f32.mrb[33].mxu1  ;;  %v1421_v43 = vpop.f32.mrb[29].mxu0 }
 0x331   : > { %v3057_v40 = vpack.c.bf16 %v1298_v56, %v1296_v37  ;;  %v3058_v41 = vpack.c.bf16 %v1421_v43, %v1419_v38  ;;  %v1300_v42 = vpop.f32.mrb[34].mxu1  ;;  %v1423_v7 = vpop.f32.mrb[30].mxu0 }
 0x332   : > { %v1302_v48 = vpop.f32.mrb[35].mxu1  ;;  %v1425_v57 = vpop.f32.mrb[31].mxu0 }
 0x333   : > { %2600 = vst [vmem:[%s4084_s4 + $0x108] sm:$0xff] %v3057_v40  ;;  %2601 = vst [vmem:[%s4084_s4 + $0x110] sm:$0xff] %v3058_v41  ;;  %v3063_v44 = vpack.c.bf16 %v1302_v48, %v1300_v42  ;;  %v3064_v13 = vpack.c.bf16 %v1425_v57, %v1423_v7 }
 0x335   : > { %2606 = vst [vmem:[%s4084_s4 + $0x134] sm:$0xff] %v3063_v44  ;;  %2607 = vst [vmem:[%s4084_s4 + $0x13c] sm:$0xff] %v3064_v13 }
 0x337   : > { %v1306_v23 = vpop.f32.mrb[36].mxu1  ;;  %v1429_v29 = vpop.f32.mrb[32].mxu0 }
 0x338   : > { %v1308_v50 = vpop.f32.mrb[37].mxu1  ;;  %v1431_v33 = vpop.f32.mrb[33].mxu0 }
 0x339   : > { %v3069_v3 = vpack.c.bf16 %v1308_v50, %v1306_v23  ;;  %v3070_v9 = vpack.c.bf16 %v1431_v33, %v1429_v29  ;;  %v1310_v60 = vpop.f32.mrb[38].mxu1  ;;  %v1433_v63 = vpop.f32.mrb[34].mxu0 }
 0x33a   : > { %v1312_v2 = vpop.f32.mrb[39].mxu1  ;;  %v1435_v5 = vpop.f32.mrb[35].mxu0 }
 0x33b   : > { %2612 = vst [vmem:[%s4084_s4 + $0x160] sm:$0xff] %v3069_v3  ;;  %2613 = vst [vmem:[%s4084_s4 + $0x168] sm:$0xff] %v3070_v9  ;;  %v3075_v53 = vpack.c.bf16 %v1312_v2, %v1310_v60  ;;  %v3076_v11 = vpack.c.bf16 %v1435_v5, %v1433_v63 }
 0x33d   : > { %2618 = vst [vmem:[%s4084_s4 + $0x18c] sm:$0xff] %v3075_v53  ;;  %2619 = vst [vmem:[%s4084_s4 + $0x194] sm:$0xff] %v3076_v11 }
 0x33f   : > { %v1316_v58 = vpop.f32.mrb[40].mxu1  ;;  %v1439_v4 = vpop.f32.mrb[36].mxu0 }
 0x340   : > { %v1318_v59 = vpop.f32.mrb[41].mxu1  ;;  %v1441_v14 = vpop.f32.mrb[37].mxu0 }
 0x341   : > { %v3081_v17 = vpack.c.bf16 %v1318_v59, %v1316_v58  ;;  %v3082_v28 = vpack.c.bf16 %v1441_v14, %v1439_v4  ;;  %v1320_v51 = vpop.f32.mrb[42].mxu1  ;;  %v1443_v47 = vpop.f32.mrb[38].mxu0 }
 0x342   : > { %v1322_v12 = vpop.f32.mrb[43].mxu1  ;;  %v1445_v0 = vpop.f32.mrb[39].mxu0 }
 0x343   : > { %2624 = vst [vmem:[%s4084_s4 + $0x1b8] sm:$0xff] %v3081_v17  ;;  %2625 = vst [vmem:[%s4084_s4 + $0x1c0] sm:$0xff] %v3082_v28  ;;  %v3087_v15 = vpack.c.bf16 %v1322_v12, %v1320_v51  ;;  %v3088_v61 = vpack.c.bf16 %v1445_v0, %v1443_v47 }
 0x345   : > { %2630 = vst [vmem:[%s4084_s4 + $0x1e4] sm:$0xff] %v3087_v15  ;;  %2631 = vst [vmem:[%s4084_s4 + $0x1ec] sm:$0xff] %v3088_v61 }
 0x347   : > { %v1326_v25 = vpop.f32.mrb[44].mxu1  ;;  %v1449_v16 = vpop.f32.mrb[40].mxu0 }
 0x348   : > { %v1328_v18 = vpop.f32.mrb[45].mxu1  ;;  %v1451_v19 = vpop.f32.mrb[41].mxu0 }
 0x349   : > { %v3093_v20 = vpack.c.bf16 %v1328_v18, %v1326_v25  ;;  %v3094_v45 = vpack.c.bf16 %v1451_v19, %v1449_v16  ;;  %v1330_v49 = vpop.f32.mrb[46].mxu1  ;;  %v1453_v21 = vpop.f32.mrb[42].mxu0 }
 0x34a   : > { %v1332_v22 = vpop.f32.mrb[47].mxu1  ;;  %v1455_v62 = vpop.f32.mrb[43].mxu0 }
 0x34b   : > { %2636 = vst [vmem:[%s4084_s4 + $0x210] sm:$0xff] %v3093_v20  ;;  %2637 = vst [vmem:[%s4084_s4 + $0x218] sm:$0xff] %v3094_v45  ;;  %v3099_v46 = vpack.c.bf16 %v1332_v22, %v1330_v49  ;;  %v3100_v36 = vpack.c.bf16 %v1455_v62, %v1453_v21 }
 0x34d   : > { %2642 = vst [vmem:[%s4084_s4 + $0x23c] sm:$0xff] %v3099_v46  ;;  %2643 = vst [vmem:[%s4084_s4 + $0x244] sm:$0xff] %v3100_v36 }
 0x34f   : > { %v1336_v24 = vpop.f32.mrb[48].mxu1  ;;  %v1459_v1 = vpop.f32.mrb[44].mxu0 }
 0x350   : > { %v1338_v26 = vpop.f32.mrb[49].mxu1  ;;  %v1461_v27 = vpop.f32.mrb[45].mxu0 }
 0x351   : > { %v3105_v30 = vpack.c.bf16 %v1338_v26, %v1336_v24  ;;  %v3106_v31 = vpack.c.bf16 %v1461_v27, %v1459_v1  ;;  %v1340_v52 = vpop.f32.mrb[50].mxu1  ;;  %v1463_v32 = vpop.f32.mrb[46].mxu0 }
 0x352   : > { %v1342_v8 = vpop.f32.mrb[51].mxu1  ;;  %v1465_v34 = vpop.f32.mrb[47].mxu0 }
 0x353   : > { %2648 = vst [vmem:[%s4084_s4 + $0x268] sm:$0xff] %v3105_v30  ;;  %2649 = vst [vmem:[%s4084_s4 + $0x270] sm:$0xff] %v3106_v31  ;;  %v3111_v35 = vpack.c.bf16 %v1342_v8, %v1340_v52  ;;  %v3112_v39 = vpack.c.bf16 %v1465_v34, %v1463_v32 }
 0x355   : > { %2654 = vst [vmem:[%s4084_s4 + $0x294] sm:$0xff] %v3111_v35  ;;  %2655 = vst [vmem:[%s4084_s4 + $0x29c] sm:$0xff] %v3112_v39 }
 0x357   : > { %v1346_v55 = vpop.f32.mrb[52].mxu1  ;;  %v1469_v10 = vpop.f32.mrb[48].mxu0 }
 0x358   : > { %v1348_v54 = vpop.f32.mrb[53].mxu1  ;;  %v1471_v6 = vpop.f32.mrb[49].mxu0 }
 0x359   : > { %v3117_v37 = vpack.c.bf16 %v1348_v54, %v1346_v55  ;;  %v3118_v38 = vpack.c.bf16 %v1471_v6, %v1469_v10  ;;  %v1350_v56 = vpop.f32.mrb[54].mxu1  ;;  %v1473_v43 = vpop.f32.mrb[50].mxu0 }
 0x35a   : > { %v1352_v40 = vpop.f32.mrb[55].mxu1  ;;  %v1475_v41 = vpop.f32.mrb[51].mxu0 }
 0x35b   : > { %2660 = vst [vmem:[%s4084_s4 + $0x2c0] sm:$0xff] %v3117_v37  ;;  %2661 = vst [vmem:[%s4084_s4 + $0x2c8] sm:$0xff] %v3118_v38  ;;  %v3123_v42 = vpack.c.bf16 %v1352_v40, %v1350_v56  ;;  %v3124_v7 = vpack.c.bf16 %v1475_v41, %v1473_v43 }
 0x35d   : > { %2666 = vst [vmem:[%s4084_s4 + $0x2ec] sm:$0xff] %v3123_v42  ;;  %2667 = vst [vmem:[%s4084_s4 + $0x2f4] sm:$0xff] %v3124_v7 }
 0x35f   : > { %v1512_v48 = vpop.f32.mrb[56].mxu1  ;;  %v1635_v57 = vpop.f32.mrb[52].mxu0 }
 0x360   : > { %v1514_v44 = vpop.f32.mrb[57].mxu1  ;;  %v1637_v13 = vpop.f32.mrb[53].mxu0 }
 0x361   : > { %v3023_v23 = vpack.c.bf16 %v1514_v44, %v1512_v48  ;;  %v3024_v29 = vpack.c.bf16 %v1637_v13, %v1635_v57  ;;  %v1516_v50 = vpop.f32.mrb[58].mxu1  ;;  %v1639_v33 = vpop.f32.mrb[54].mxu0 }
 0x362   : > { %v1518_v3 = vpop.f32.mrb[59].mxu1  ;;  %v1641_v9 = vpop.f32.mrb[55].mxu0 }
 0x363   : > { %2566 = vst [vmem:[%s4084_s4 + $0x10] sm:$0xff] %v3023_v23  ;;  %2567 = vst [vmem:[%s4084_s4 + $0x18] sm:$0xff] %v3024_v29  ;;  %v3029_v60 = vpack.c.bf16 %v1518_v3, %v1516_v50  ;;  %v3030_v63 = vpack.c.bf16 %v1641_v9, %v1639_v33 }
 0x365   : > { %2572 = vst [vmem:[%s4084_s4 + $0x3c] sm:$0xff] %v3029_v60  ;;  %2573 = vst [vmem:[%s4084_s4 + $0x44] sm:$0xff] %v3030_v63 }
 0x367   : > { %v1522_v2 = vpop.f32.mrb[60].mxu1  ;;  %v1645_v5 = vpop.f32.mrb[56].mxu0 }
 0x368   : > { %v1524_v53 = vpop.f32.mrb[61].mxu1  ;;  %v1647_v11 = vpop.f32.mrb[57].mxu0 }
 0x369   : > { %v3035_v58 = vpack.c.bf16 %v1524_v53, %v1522_v2  ;;  %v3036_v4 = vpack.c.bf16 %v1647_v11, %v1645_v5  ;;  %v1526_v59 = vpop.f32.mrb[62].mxu1  ;;  %v1649_v14 = vpop.f32.mrb[58].mxu0 }
 0x36a   : > { %v1528_v17 = vpop.f32.mrb[63].mxu1  ;;  %v1651_v28 = vpop.f32.mrb[59].mxu0 }
 0x36b   : > { %2578 = vst [vmem:[%s4084_s4 + $0x68] sm:$0xff] %v3035_v58  ;;  %2579 = vst [vmem:[%s4084_s4 + $0x70] sm:$0xff] %v3036_v4  ;;  %v3041_v51 = vpack.c.bf16 %v1528_v17, %v1526_v59  ;;  %v3042_v47 = vpack.c.bf16 %v1651_v28, %v1649_v14 }
 0x36d   : > { %2584 = vst [vmem:[%s4084_s4 + $0x94] sm:$0xff] %v3041_v51  ;;  %2585 = vst [vmem:[%s4084_s4 + $0x9c] sm:$0xff] %v3042_v47 }
 0x36f   : > { %v1532_v12 = vpop.f32.mrb[64].mxu1  ;;  %v1655_v0 = vpop.f32.mrb[60].mxu0 }
 0x370   : > { %v1534_v15 = vpop.f32.mrb[65].mxu1  ;;  %v1657_v61 = vpop.f32.mrb[61].mxu0 }
 0x371   : > { %v3047_v25 = vpack.c.bf16 %v1534_v15, %v1532_v12  ;;  %v3048_v16 = vpack.c.bf16 %v1657_v61, %v1655_v0  ;;  %v1536_v18 = vpop.f32.mrb[66].mxu1  ;;  %v1659_v19 = vpop.f32.mrb[62].mxu0 }
 0x372   : > { %v1538_v20 = vpop.f32.mrb[67].mxu1  ;;  %v1661_v45 = vpop.f32.mrb[63].mxu0 }
 0x373   : > { %2590 = vst [vmem:[%s4084_s4 + $0xc0] sm:$0xff] %v3047_v25  ;;  %2591 = vst [vmem:[%s4084_s4 + $0xc8] sm:$0xff] %v3048_v16  ;;  %v3053_v49 = vpack.c.bf16 %v1538_v20, %v1536_v18  ;;  %v3054_v21 = vpack.c.bf16 %v1661_v45, %v1659_v19 }
 0x375   : > { %2596 = vst [vmem:[%s4084_s4 + $0xec] sm:$0xff] %v3053_v49  ;;  %2597 = vst [vmem:[%s4084_s4 + $0xf4] sm:$0xff] %v3054_v21 }
 0x377   : > { %v1542_v22 = vpop.f32.mrb[68].mxu1  ;;  %v1665_v62 = vpop.f32.mrb[64].mxu0 }
 0x378   : > { %v1544_v46 = vpop.f32.mrb[69].mxu1  ;;  %v1667_v36 = vpop.f32.mrb[65].mxu0 }
 0x379   : > { %v3059_v24 = vpack.c.bf16 %v1544_v46, %v1542_v22  ;;  %v3060_v1 = vpack.c.bf16 %v1667_v36, %v1665_v62  ;;  %v1546_v26 = vpop.f32.mrb[70].mxu1  ;;  %v1669_v27 = vpop.f32.mrb[66].mxu0 }
 0x37a   : > { %v1548_v30 = vpop.f32.mrb[71].mxu1  ;;  %v1671_v31 = vpop.f32.mrb[67].mxu0 }
 0x37b   : > { %2602 = vst [vmem:[%s4084_s4 + $0x118] sm:$0xff] %v3059_v24  ;;  %2603 = vst [vmem:[%s4084_s4 + $0x120] sm:$0xff] %v3060_v1  ;;  %v3065_v52 = vpack.c.bf16 %v1548_v30, %v1546_v26  ;;  %v3066_v32 = vpack.c.bf16 %v1671_v31, %v1669_v27 }
 0x37d   : > { %2608 = vst [vmem:[%s4084_s4 + $0x144] sm:$0xff] %v3065_v52  ;;  %2609 = vst [vmem:[%s4084_s4 + $0x14c] sm:$0xff] %v3066_v32 }
 0x37f   : > { %v1552_v8 = vpop.f32.mrb[72].mxu1  ;;  %v1675_v34 = vpop.f32.mrb[68].mxu0 }
 0x380   : > { %v1554_v35 = vpop.f32.mrb[73].mxu1  ;;  %v1677_v39 = vpop.f32.mrb[69].mxu0 }
 0x381   : > { %v3071_v55 = vpack.c.bf16 %v1554_v35, %v1552_v8  ;;  %v3072_v10 = vpack.c.bf16 %v1677_v39, %v1675_v34  ;;  %v1556_v54 = vpop.f32.mrb[74].mxu1  ;;  %v1679_v6 = vpop.f32.mrb[70].mxu0 }
 0x382   : > { %v1558_v37 = vpop.f32.mrb[75].mxu1  ;;  %v1681_v38 = vpop.f32.mrb[71].mxu0 }
 0x383   : > { %2614 = vst [vmem:[%s4084_s4 + $0x170] sm:$0xff] %v3071_v55  ;;  %2615 = vst [vmem:[%s4084_s4 + $0x178] sm:$0xff] %v3072_v10  ;;  %v3077_v56 = vpack.c.bf16 %v1558_v37, %v1556_v54  ;;  %v3078_v43 = vpack.c.bf16 %v1681_v38, %v1679_v6 }
 0x385   : > { %2620 = vst [vmem:[%s4084_s4 + $0x19c] sm:$0xff] %v3077_v56  ;;  %2621 = vst [vmem:[%s4084_s4 + $0x1a4] sm:$0xff] %v3078_v43 }
 0x387   : > { %v1562_v40 = vpop.f32.mrb[76].mxu1  ;;  %v1685_v41 = vpop.f32.mrb[72].mxu0 }
 0x388   : > { %v1564_v42 = vpop.f32.mrb[77].mxu1  ;;  %v1687_v7 = vpop.f32.mrb[73].mxu0 }
 0x389   : > { %v3083_v48 = vpack.c.bf16 %v1564_v42, %v1562_v40  ;;  %v3084_v57 = vpack.c.bf16 %v1687_v7, %v1685_v41  ;;  %v1566_v44 = vpop.f32.mrb[78].mxu1  ;;  %v1689_v13 = vpop.f32.mrb[74].mxu0 }
 0x38a   : > { %v1568_v23 = vpop.f32.mrb[79].mxu1  ;;  %v1691_v29 = vpop.f32.mrb[75].mxu0 }
 0x38b   : > { %2626 = vst [vmem:[%s4084_s4 + $0x1c8] sm:$0xff] %v3083_v48  ;;  %2627 = vst [vmem:[%s4084_s4 + $0x1d0] sm:$0xff] %v3084_v57  ;;  %v3089_v50 = vpack.c.bf16 %v1568_v23, %v1566_v44  ;;  %v3090_v33 = vpack.c.bf16 %v1691_v29, %v1689_v13 }
 0x38d   : > { %2632 = vst [vmem:[%s4084_s4 + $0x1f4] sm:$0xff] %v3089_v50  ;;  %2633 = vst [vmem:[%s4084_s4 + $0x1fc] sm:$0xff] %v3090_v33 }
 0x38f   : > { %v1572_v3 = vpop.f32.mrb[80].mxu1  ;;  %v1695_v9 = vpop.f32.mrb[76].mxu0 }
 0x390   : > { %v1574_v60 = vpop.f32.mrb[81].mxu1  ;;  %v1697_v63 = vpop.f32.mrb[77].mxu0 }
 0x391   : > { %v3095_v2 = vpack.c.bf16 %v1574_v60, %v1572_v3  ;;  %v3096_v5 = vpack.c.bf16 %v1697_v63, %v1695_v9  ;;  %v1576_v53 = vpop.f32.mrb[82].mxu1  ;;  %v1699_v11 = vpop.f32.mrb[78].mxu0 }
 0x392   : > { %v1578_v58 = vpop.f32.mrb[83].mxu1  ;;  %v1701_v4 = vpop.f32.mrb[79].mxu0 }
 0x393   : > { %2638 = vst [vmem:[%s4084_s4 + $0x220] sm:$0xff] %v3095_v2  ;;  %2639 = vst [vmem:[%s4084_s4 + $0x228] sm:$0xff] %v3096_v5  ;;  %v3101_v59 = vpack.c.bf16 %v1578_v58, %v1576_v53  ;;  %v3102_v14 = vpack.c.bf16 %v1701_v4, %v1699_v11 }
 0x395   : > { %2644 = vst [vmem:[%s4084_s4 + $0x24c] sm:$0xff] %v3101_v59  ;;  %2645 = vst [vmem:[%s4084_s4 + $0x254] sm:$0xff] %v3102_v14 }
 0x397   : > { %v1582_v17 = vpop.f32.mrb[84].mxu1  ;;  %v1705_v28 = vpop.f32.mrb[80].mxu0 }
 0x398   : > { %v1584_v51 = vpop.f32.mrb[85].mxu1  ;;  %v1707_v47 = vpop.f32.mrb[81].mxu0 }
 0x399   : > { %v3107_v12 = vpack.c.bf16 %v1584_v51, %v1582_v17  ;;  %v3108_v0 = vpack.c.bf16 %v1707_v47, %v1705_v28  ;;  %v1586_v15 = vpop.f32.mrb[86].mxu1  ;;  %v1709_v61 = vpop.f32.mrb[82].mxu0 }
 0x39a   : > { %v1588_v25 = vpop.f32.mrb[87].mxu1  ;;  %v1711_v16 = vpop.f32.mrb[83].mxu0 }
 0x39b   : > { %2650 = vst [vmem:[%s4084_s4 + $0x278] sm:$0xff] %v3107_v12  ;;  %2651 = vst [vmem:[%s4084_s4 + $0x280] sm:$0xff] %v3108_v0  ;;  %v3113_v18 = vpack.c.bf16 %v1588_v25, %v1586_v15  ;;  %v3114_v19 = vpack.c.bf16 %v1711_v16, %v1709_v61 }
 0x39d   : > { %2656 = vst [vmem:[%s4084_s4 + $0x2a4] sm:$0xff] %v3113_v18  ;;  %2657 = vst [vmem:[%s4084_s4 + $0x2ac] sm:$0xff] %v3114_v19 }
 0x39f   : > { %v1592_v20 = vpop.f32.mrb[88].mxu1  ;;  %v1715_v45 = vpop.f32.mrb[84].mxu0 }
 0x3a0   : > { %v1594_v49 = vpop.f32.mrb[89].mxu1  ;;  %v1717_v21 = vpop.f32.mrb[85].mxu0 }
 0x3a1   : > { %v3119_v22 = vpack.c.bf16 %v1594_v49, %v1592_v20  ;;  %v3120_v62 = vpack.c.bf16 %v1717_v21, %v1715_v45  ;;  %v1596_v46 = vpop.f32.mrb[90].mxu1  ;;  %v1719_v36 = vpop.f32.mrb[86].mxu0 }
 0x3a2   : > { %v1598_v24 = vpop.f32.mrb[91].mxu1  ;;  %v1721_v1 = vpop.f32.mrb[87].mxu0 }
 0x3a3   : > { %2662 = vst [vmem:[%s4084_s4 + $0x2d0] sm:$0xff] %v3119_v22  ;;  %2663 = vst [vmem:[%s4084_s4 + $0x2d8] sm:$0xff] %v3120_v62  ;;  %v3125_v26 = vpack.c.bf16 %v1598_v24, %v1596_v46  ;;  %v3126_v27 = vpack.c.bf16 %v1721_v1, %v1719_v36 }
 0x3a5   : > { %2668 = vst [vmem:[%s4084_s4 + $0x2fc] sm:$0xff] %v3125_v26  ;;  %2669 = vst [vmem:[%s4084_s4 + $0x304] sm:$0xff] %v3126_v27 }
 0x3a7   : > { %v1758_v30 = vpop.f32.mrb[92].mxu1  ;;  %v1881_v31 = vpop.f32.mrb[88].mxu0 }
 0x3a8   : > { %v3026_v52 = vpack.c.bf16 %v1881_v31, %v1881_v31  ;;  %v1760_v32 = vpop.f32.mrb[93].mxu1  ;;  %v3233_v8 = vpop.f32.mrb[89].mxu0 }
 0x3a9   : > { %v3025_v34 = vpack.c.bf16 %v1760_v32, %v1758_v30  ;;  %v1762_v35 = vpop.f32.mrb[94].mxu1  ;;  %v1884_v39 = vpop.f32.mrb[90].mxu0 }
 0x3aa   : > { %2569 = vst [vmem:[%s4084_s4 + $0x28] sm:$0xf] %v3026_v52  ;;  %v3032_v55 = vpack.c.bf16 %v1884_v39, %v1884_v39  ;;  %v1764_v10 = vpop.f32.mrb[95].mxu1  ;;  %v3234_v54 = vpop.f32.mrb[91].mxu0 }
 0x3ab   : > { %2568 = vst [vmem:[%s4084_s4 + $0x20] sm:$0xff] %v3025_v34  ;;  %v3031_v6 = vpack.c.bf16 %v1764_v10, %v1762_v35 }
 0x3ac   : > { %2575 = vst [vmem:[%s4084_s4 + $0x54] sm:$0xf] %v3032_v55 }
 0x3ad   : > { %2574 = vst [vmem:[%s4084_s4 + $0x4c] sm:$0xff] %v3031_v6 }
 0x3af   : > { %v1768_v37 = vpop.f32.mrb[96].mxu1  ;;  %v1889_v38 = vpop.f32.mrb[92].mxu0 }
 0x3b0   : > { %v3038_v56 = vpack.c.bf16 %v1889_v38, %v1889_v38  ;;  %v1770_v43 = vpop.f32.mrb[97].mxu1  ;;  %v3237_v40 = vpop.f32.mrb[93].mxu0 }
 0x3b1   : > { %v3037_v41 = vpack.c.bf16 %v1770_v43, %v1768_v37  ;;  %v1772_v42 = vpop.f32.mrb[98].mxu1  ;;  %v1892_v7 = vpop.f32.mrb[94].mxu0 }
 0x3b2   : > { %2581 = vst [vmem:[%s4084_s4 + $0x80] sm:$0xf] %v3038_v56  ;;  %v3044_v48 = vpack.c.bf16 %v1892_v7, %v1892_v7  ;;  %v1774_v57 = vpop.f32.mrb[99].mxu1  ;;  %v3238_v44 = vpop.f32.mrb[95].mxu0 }
 0x3b3   : > { %2580 = vst [vmem:[%s4084_s4 + $0x78] sm:$0xff] %v3037_v41  ;;  %v3043_v13 = vpack.c.bf16 %v1774_v57, %v1772_v42 }
 0x3b4   : > { %2587 = vst [vmem:[%s4084_s4 + $0xac] sm:$0xf] %v3044_v48 }
 0x3b5   : > { %2586 = vst [vmem:[%s4084_s4 + $0xa4] sm:$0xff] %v3043_v13 }
 0x3b7   : > { %v1778_v23 = vpop.f32.mrb[100].mxu1  ;;  %v1897_v29 = vpop.f32.mrb[96].mxu0 }
 0x3b8   : > { %v3050_v50 = vpack.c.bf16 %v1897_v29, %v1897_v29  ;;  %v1780_v33 = vpop.f32.mrb[101].mxu1  ;;  %v3241_v3 = vpop.f32.mrb[97].mxu0 }
 0x3b9   : > { %v3049_v9 = vpack.c.bf16 %v1780_v33, %v1778_v23  ;;  %v1782_v60 = vpop.f32.mrb[102].mxu1  ;;  %v1900_v63 = vpop.f32.mrb[98].mxu0 }
 0x3ba   : > { %2593 = vst [vmem:[%s4084_s4 + $0xd8] sm:$0xf] %v3050_v50  ;;  %v3056_v2 = vpack.c.bf16 %v1900_v63, %v1900_v63  ;;  %v1784_v5 = vpop.f32.mrb[103].mxu1  ;;  %v3242_v53 = vpop.f32.mrb[99].mxu0 }
 0x3bb   : > { %2592 = vst [vmem:[%s4084_s4 + $0xd0] sm:$0xff] %v3049_v9  ;;  %v3055_v11 = vpack.c.bf16 %v1784_v5, %v1782_v60 }
 0x3bc   : > { %2599 = vst [vmem:[%s4084_s4 + $0x104] sm:$0xf] %v3056_v2 }
 0x3bd   : > { %2598 = vst [vmem:[%s4084_s4 + $0xfc] sm:$0xff] %v3055_v11 }
 0x3bf   : > { %v1788_v58 = vpop.f32.mrb[104].mxu1  ;;  %v1905_v4 = vpop.f32.mrb[100].mxu0 }
 0x3c0   : > { %v3062_v59 = vpack.c.bf16 %v1905_v4, %v1905_v4  ;;  %v1790_v14 = vpop.f32.mrb[105].mxu1  ;;  %v3245_v17 = vpop.f32.mrb[101].mxu0 }
 0x3c1   : > { %v3061_v28 = vpack.c.bf16 %v1790_v14, %v1788_v58  ;;  %v1792_v51 = vpop.f32.mrb[106].mxu1  ;;  %v1908_v47 = vpop.f32.mrb[102].mxu0 }
 0x3c2   : > { %2605 = vst [vmem:[%s4084_s4 + $0x130] sm:$0xf] %v3062_v59  ;;  %v3068_v12 = vpack.c.bf16 %v1908_v47, %v1908_v47  ;;  %v1794_v0 = vpop.f32.mrb[107].mxu1  ;;  %v3246_v15 = vpop.f32.mrb[103].mxu0 }
 0x3c3   : > { %2604 = vst [vmem:[%s4084_s4 + $0x128] sm:$0xff] %v3061_v28  ;;  %v3067_v61 = vpack.c.bf16 %v1794_v0, %v1792_v51 }
 0x3c4   : > { %2611 = vst [vmem:[%s4084_s4 + $0x15c] sm:$0xf] %v3068_v12 }
 0x3c5   : > { %2610 = vst [vmem:[%s4084_s4 + $0x154] sm:$0xff] %v3067_v61 }
 0x3c7   : > { %v1798_v25 = vpop.f32.mrb[108].mxu1  ;;  %v1913_v16 = vpop.f32.mrb[104].mxu0 }
 0x3c8   : > { %v3074_v18 = vpack.c.bf16 %v1913_v16, %v1913_v16  ;;  %v1800_v19 = vpop.f32.mrb[109].mxu1  ;;  %v3249_v20 = vpop.f32.mrb[105].mxu0 }
 0x3c9   : > { %v3073_v45 = vpack.c.bf16 %v1800_v19, %v1798_v25  ;;  %v1802_v49 = vpop.f32.mrb[110].mxu1  ;;  %v1916_v21 = vpop.f32.mrb[106].mxu0 }
 0x3ca   : > { %2617 = vst [vmem:[%s4084_s4 + $0x188] sm:$0xf] %v3074_v18  ;;  %v3080_v22 = vpack.c.bf16 %v1916_v21, %v1916_v21  ;;  %v1804_v62 = vpop.f32.mrb[111].mxu1  ;;  %v3250_v46 = vpop.f32.mrb[107].mxu0 }
 0x3cb   : > { %2616 = vst [vmem:[%s4084_s4 + $0x180] sm:$0xff] %v3073_v45  ;;  %v3079_v36 = vpack.c.bf16 %v1804_v62, %v1802_v49 }
 0x3cc   : > { %2623 = vst [vmem:[%s4084_s4 + $0x1b4] sm:$0xf] %v3080_v22 }
 0x3cd   : > { %2622 = vst [vmem:[%s4084_s4 + $0x1ac] sm:$0xff] %v3079_v36 }
 0x3cf   : > { %v1808_v24 = vpop.f32.mrb[112].mxu1  ;;  %v1921_v1 = vpop.f32.mrb[108].mxu0 }
 0x3d0   : > { %v3086_v26 = vpack.c.bf16 %v1921_v1, %v1921_v1  ;;  %v1810_v27 = vpop.f32.mrb[113].mxu1  ;;  %v3253_v30 = vpop.f32.mrb[109].mxu0 }
 0x3d1   : > { %v3085_v31 = vpack.c.bf16 %v1810_v27, %v1808_v24  ;;  %v1812_v52 = vpop.f32.mrb[114].mxu1  ;;  %v1924_v32 = vpop.f32.mrb[110].mxu0 }
 0x3d2   : > { %2629 = vst [vmem:[%s4084_s4 + $0x1e0] sm:$0xf] %v3086_v26  ;;  %v3092_v8 = vpack.c.bf16 %v1924_v32, %v1924_v32  ;;  %v1814_v34 = vpop.f32.mrb[115].mxu1  ;;  %v3254_v35 = vpop.f32.mrb[111].mxu0 }
 0x3d3   : > { %2628 = vst [vmem:[%s4084_s4 + $0x1d8] sm:$0xff] %v3085_v31  ;;  %v3091_v39 = vpack.c.bf16 %v1814_v34, %v1812_v52 }
 0x3d4   : > { %2635 = vst [vmem:[%s4084_s4 + $0x20c] sm:$0xf] %v3092_v8 }
 0x3d5   : > { %2634 = vst [vmem:[%s4084_s4 + $0x204] sm:$0xff] %v3091_v39 }
 0x3d7   : > { %v1818_v55 = vpop.f32.mrb[116].mxu1  ;;  %v1929_v10 = vpop.f32.mrb[112].mxu0 }
 0x3d8   : > { %v3098_v54 = vpack.c.bf16 %v1929_v10, %v1929_v10  ;;  %v1820_v6 = vpop.f32.mrb[117].mxu1  ;;  %v3257_v37 = vpop.f32.mrb[113].mxu0 }
 0x3d9   : > { %v3097_v38 = vpack.c.bf16 %v1820_v6, %v1818_v55  ;;  %v1822_v56 = vpop.f32.mrb[118].mxu1  ;;  %v1932_v43 = vpop.f32.mrb[114].mxu0 }
 0x3da   : > { %2641 = vst [vmem:[%s4084_s4 + $0x238] sm:$0xf] %v3098_v54  ;;  %v3104_v40 = vpack.c.bf16 %v1932_v43, %v1932_v43  ;;  %v1824_v41 = vpop.f32.mrb[119].mxu1  ;;  %v3258_v42 = vpop.f32.mrb[115].mxu0 }
 0x3db   : > { %2640 = vst [vmem:[%s4084_s4 + $0x230] sm:$0xff] %v3097_v38  ;;  %v3103_v7 = vpack.c.bf16 %v1824_v41, %v1822_v56 }
 0x3dc   : > { %2647 = vst [vmem:[%s4084_s4 + $0x264] sm:$0xf] %v3104_v40 }
 0x3dd   : > { %2646 = vst [vmem:[%s4084_s4 + $0x25c] sm:$0xff] %v3103_v7 }
 0x3df   : > { %v1828_v48 = vpop.f32.mrb[120].mxu1  ;;  %v1937_v57 = vpop.f32.mrb[116].mxu0 }
 0x3e0   : > { %v3110_v44 = vpack.c.bf16 %v1937_v57, %v1937_v57  ;;  %v1830_v13 = vpop.f32.mrb[121].mxu1  ;;  %v3261_v23 = vpop.f32.mrb[117].mxu0 }
 0x3e1   : > { %v3109_v29 = vpack.c.bf16 %v1830_v13, %v1828_v48  ;;  %v1832_v50 = vpop.f32.mrb[122].mxu1  ;;  %v1940_v33 = vpop.f32.mrb[118].mxu0 }
 0x3e2   : > { %2653 = vst [vmem:[%s4084_s4 + $0x290] sm:$0xf] %v3110_v44  ;;  %v3116_v3 = vpack.c.bf16 %v1940_v33, %v1940_v33  ;;  %v1834_v9 = vpop.f32.mrb[123].mxu1  ;;  %v3262_v60 = vpop.f32.mrb[119].mxu0 }
 0x3e3   : > { %2652 = vst [vmem:[%s4084_s4 + $0x288] sm:$0xff] %v3109_v29  ;;  %v3115_v63 = vpack.c.bf16 %v1834_v9, %v1832_v50 }
 0x3e4   : > { %2659 = vst [vmem:[%s4084_s4 + $0x2bc] sm:$0xf] %v3116_v3 }
 0x3e5   : > { %2658 = vst [vmem:[%s4084_s4 + $0x2b4] sm:$0xff] %v3115_v63 }
 0x3e7   : > { %v1838_v2 = vpop.f32.mrb[124].mxu1  ;;  %v1945_v5 = vpop.f32.mrb[120].mxu0 }
 0x3e8   : > { %v3122_v53 = vpack.c.bf16 %v1945_v5, %v1945_v5  ;;  %v1840_v11 = vpop.f32.mrb[125].mxu1  ;;  %v3265_v58 = vpop.f32.mrb[121].mxu0 }
 0x3e9   : > { %v3121_v4 = vpack.c.bf16 %v1840_v11, %v1838_v2  ;;  %v1842_v59 = vpop.f32.mrb[126].mxu1  ;;  %v1948_v14 = vpop.f32.mrb[122].mxu0 }
 0x3ea   : > { %2665 = vst [vmem:[%s4084_s4 + $0x2e8] sm:$0xf] %v3122_v53  ;;  %v3128_v17 = vpack.c.bf16 %v1948_v14, %v1948_v14  ;;  %v1844_v28 = vpop.f32.mrb[127].mxu1  ;;  %v3266_v51 = vpop.f32.mrb[123].mxu0 }
 0x3eb   : > { %2664 = vst [vmem:[%s4084_s4 + $0x2e0] sm:$0xff] %v3121_v4  ;;  %v3127_v47 = vpack.c.bf16 %v1844_v28, %v1842_v59 }
 0x3ec   : > { %2671 = vst [vmem:[%s4084_s4 + $0x314] sm:$0xf] %v3128_v17 }
 0x3ed   : > { %2670 = vst [vmem:[%s4084_s4 + $0x30c] sm:$0xff] %v3127_v47 }
 0x3ee PF: > { %s13_s14 = sadd.s32 1, %s3552_s14   ;;  %s4207_s12 = smov %s3548_s13 }
 0x3ef   : > { %p10_p5 = scmp.ge.s32.totalorder %s13_s14, 4   ;;  %s4208_s13 = smov %s4210_s15 }
 0x3f1   :  { %12 = sbr.rel (!%p10_p5) target bundleno = 2 (0x2), region = 68 }

</bundles_post_ra>
